<compile_context>
chip_gen: v5e
topology: v5e:2x2
jax: 0.10.0
libtpu: 0.0.40
codegen_flags: <defaults>
</compile_context>

<pallas_src>
import jax
import jax.numpy as jnp
from jax.experimental import pallas as pl
from jax.experimental.pallas import tpu as pltpu


# ------------------------------ small helpers ------------------------------ #
def _round_up(x, m):
    return (x + m - 1) // m * m


def _vmem_limit(est_bytes):
    """VMEM limit from the actual buffer footprint (+~30% headroom for
    compiler temporaries), clamped to the chip's physical capacity
    (64 MiB on v7x, 128 MiB on v5e/v6e)."""
    try:
        cap = pltpu.get_tpu_info().vmem_capacity_bytes
    except Exception:
        cap = 64 * 1024 * 1024
    want = int(est_bytes * 1.3) + (8 << 20)
    return int(min(0.9 * cap, max(want, 32 << 20)))


def _block_spec(shape, index_map, *, single_buffer=False):
    """BlockSpec builder.  Operands whose index map is constant never change
    blocks, so the default second pipeline buffer is pure VMEM waste -> request
    a single buffer for them."""
    if single_buffer:
        try:
            return pl.BlockSpec(shape, index_map, pipeline_mode=pl.Buffered(1))
        except TypeError:      # pragma: no cover - jax without pipeline_mode kwarg
            pass
    return pl.BlockSpec(shape, index_map)


# --------------------------- kernel 1: att + LSTM --------------------------- #
def _make_cell_kernel(D, A, E, inv_num_pixels):
    def kernel(img_ref, wf_ref, pmask_ref,
               init_hc_w_ref, init_hc_b_ref,
               enc_w_ref, enc_b_ref, full_w_ref,
               h_proj_w_ref, h_proj_b_ref,
               w_ih_wf_ref, w_ih_awe_ref,
               h_ref, c_ref):
        img = img_ref[...]                                     # (TB, P_pad, E) f32
        tb, p_pix, _ = img.shape
        img_bf = img.astype(jnp.bfloat16)
        wf = wf_ref[...].astype(jnp.bfloat16)                  # (TB, EMB)

        # init_hidden: mean over the TRUE pixel count (pixel padding is zero),
        # fused [init_h | init_c] matmul.
        feat_mean = jnp.sum(img, axis=1) * inv_num_pixels      # (TB, E)
        hc0 = (jnp.dot(feat_mean.astype(jnp.bfloat16), init_hc_w_ref[...],
                       preferred_element_type=jnp.float32)
               + init_hc_b_ref[...])                           # (TB, 2D) f32
        h0 = hc0[:, :D]
        c0 = hc0[:, D:]

        # attention: encoder projection over all pixels (bf16 MXU, f32 accum)
        att1 = (jnp.dot(img_bf.reshape(tb * p_pix, E), enc_w_ref[...],
                        preferred_element_type=jnp.float32)
                + enc_b_ref[...])                              # (TB*P, A)

        # fused h0 projection: [decoder_att | f_beta | w_hh (+ b_ih)]
        # TODO(synk): at production dims pad A/E/D segment boundaries to 128 so
        # these lane slices are vreg-aligned (perf-review item 9).
        hproj = (jnp.dot(h0.astype(jnp.bfloat16), h_proj_w_ref[...],
                         preferred_element_type=jnp.float32)
                 + h_proj_b_ref[...])                          # (TB, A+E+4D)
        att2 = hproj[:, :A]
        gate_pre = hproj[:, A:A + E]
        hh = hproj[:, A + E:]

        e = jnp.maximum(att1.reshape(tb, p_pix, A) + att2[:, None, :], 0.0)
        # full_att (A -> 1) lane reduction; its bias is a constant shift that
        # cancels in the pixel softmax below, so it is omitted.
        att = jnp.sum(e * full_w_ref[...], axis=2) + pmask_ref[...]   # (TB, P)

        att_max = jnp.max(att, axis=1, keepdims=True)
        att_exp = jnp.exp(att - att_max)
        denom = jnp.sum(att_exp, axis=1, keepdims=True)
        alpha = att_exp * pl.reciprocal(denom, approx=True)    # softmax over pixels

        # attention-weighted encoding on the MXU (batched matvec over pixels)
        awe = jnp.einsum("bqp,bpe->bqe", alpha[:, None, :], img,
                         preferred_element_type=jnp.float32).reshape(tb, E)
        awe = jax.nn.sigmoid(gate_pre) * awe                   # gated

        # LSTMCell, PyTorch gate order (i, f, g, o); concat(word, awe) folded
        # into two matmuls, b_ih folded into hh host-side.
        gates = (jnp.dot(wf, w_ih_wf_ref[...],
                         preferred_element_type=jnp.float32)
                 + jnp.dot(awe.astype(jnp.bfloat16), w_ih_awe_ref[...],
                           preferred_element_type=jnp.float32)
                 + hh)                                         # (TB, 4D)
        i_g = jax.nn.sigmoid(gates[:, 0:D])
        f_g = jax.nn.sigmoid(gates[:, D:2 * D])
        g_g = jnp.tanh(gates[:, 2 * D:3 * D])
        o_g = jax.nn.sigmoid(gates[:, 3 * D:4 * D])
        c_new = f_g * c0 + i_g * g_g
        h_new = o_g * jnp.tanh(c_new)

        h_ref[...] = h_new
        c_ref[...] = c_new

    return kernel


# ---------------- kernel 2: fc + online logsumexp + log_softmax ------------- #
def _make_fc_kernel(TV, NV):
    def kernel(h_ref, fc_w_ref, fc_b_ref,
               logits_ref, log_probs_ref,
               m_sc, s_sc, stage_sc):
        v = pl.program_id(1)

        @pl.when(v == 0)
        def _init():
            m_sc[...] = jnp.full_like(m_sc, -jnp.inf)
            s_sc[...] = jnp.zeros_like(s_sc)

        h_bf = h_ref[...].astype(jnp.bfloat16)                 # (TB, D)
        logits_tile = (jnp.dot(h_bf, fc_w_ref[...],            # bf16 MXU, f32 acc
                               preferred_element_type=jnp.float32)
                       + fc_b_ref[...])                        # (TB, TV)
        logits_ref[...] = logits_tile                          # streamed, lane-dense
        stage_sc[v] = logits_tile                              # staged for log_softmax

        m_prev = m_sc[...]
        m_new = jnp.maximum(m_prev, jnp.max(logits_tile, axis=1, keepdims=True))
        s_sc[...] = (s_sc[...] * jnp.exp(m_prev - m_new)
                     + jnp.sum(jnp.exp(logits_tile - m_new), axis=1, keepdims=True))
        m_sc[...] = m_new

        @pl.when(v == NV - 1)
        def _finalize():
            lse = m_sc[...] + jnp.log(s_sc[...])               # (TB, 1)
            # Static (128-aligned) lane slices into the batch-resident output.
            for i in range(NV):
                log_probs_ref[:, i * TV:(i + 1) * TV] = stage_sc[i] - lse

    return kernel


# ---------------------------------- wrapper --------------------------------- #
def decoder_att_cell(tokens, img_nchw, p, *,
                     cell_batch_tile=None, fc_batch_tile=None, vocab_tile=2048):
    """Forward pass of DecoderAttCell (states=None path).

    Returns (log_probs, logits, h, c).
    """
    # TODO(synk): support caller-provided states {'h','c'} (skips init_hidden);
    # only the states=None path of the PyTorch forward is implemented here.
    B, E, H, W = img_nchw.shape
    P = H * W
    D = p["init_h_b"].shape[-1]
    A = p["enc_b"].shape[-1]
    EMB = p["embedding"].shape[-1]
    V = p["fc_b"].shape[-1]

    # --- plain-JAX glue: embedding gather + NCHW -> (B, P, E) ----------------
    # TODO(synk): feed NHWC / (B, P, E) directly from the encoder to avoid this
    # extra HBM round trip over the largest activation tensor.
    wf = jnp.take(p["embedding"], tokens, axis=0)                 # (B, EMB)
    img = jnp.transpose(img_nchw, (0, 2, 3, 1)).reshape(B, P, E)

    # --- padding / tile choices ----------------------------------------------
    TB_cell = cell_batch_tile if cell_batch_tile is not None else min(_round_up(B, 8), 64)
    B_pad = _round_up(B, TB_cell)
    # One HBM pass over fc_w by default (largest possible fc batch tile).
    # TODO(synk): on v7x use fc_batch_tile = B_pad // 2 so both TensorCores work.
    TB_fc = fc_batch_tile if fc_batch_tile is not None else B_pad
    assert B_pad % TB_fc == 0, "fc_batch_tile must divide the padded batch"

    P_pad = _round_up(P, 8)
    TV = min(_round_up(vocab_tile, 128), _round_up(V, 128))
    V_pad = _round_up(V, TV)
    NV = V_pad // TV
    HP = A + E + 4 * D

    if B_pad != B or P_pad != P:
        img = jnp.pad(img, ((0, B_pad - B), (0, P_pad - P), (0, 0)))   # zero pads!
    if B_pad != B:
        wf = jnp.pad(wf, ((0, B_pad - B), (0, 0)))
    pmask = jnp.zeros((1, P_pad), jnp.float32)
    if P_pad != P:
        pmask = pmask.at[:, P:].set(-1e30)

    fc_w, fc_b = p["fc_w"], p["fc_b"]
    if V_pad != V:
        fc_w = jnp.pad(fc_w, ((0, 0), (0, V_pad - V)))
        # -1e30 bias => padded logits ~ -1e30 => exp() == 0 in the logsumexp.
        fc_b = jnp.pad(fc_b, ((0, 0), (0, V_pad - V)), constant_values=-1e30)

    # --- host-side weight fusion + bf16 cast (f32 accumulation in-kernel) ----
    bf16 = jnp.bfloat16
    init_hc_w = jnp.concatenate([p["init_h_w"], p["init_c_w"]], axis=1).astype(bf16)
    init_hc_b = jnp.concatenate([p["init_h_b"], p["init_c_b"]], axis=1)
    h_proj_w = jnp.concatenate([p["dec_w"], p["f_beta_w"], p["w_hh"]], axis=1).astype(bf16)
    h_proj_b = jnp.concatenate([p["dec_b"], p["f_beta_b"], p["b_hh"] + p["b_ih"]], axis=1)
    enc_w = p["enc_w"].astype(bf16)
    w_ih_wf = p["w_ih_wf"].astype(bf16)
    w_ih_awe = p["w_ih_awe"].astype(bf16)
    fc_w = fc_w.astype(bf16)

    f32b, bf16b = 4, 2

    # =================== kernel 1: attention + LSTM cell ====================
    const2 = lambda b: (0, 0)
    cspec = lambda shape: _block_spec(shape, const2, single_buffer=True)

    cell_in_specs = [
        pl.BlockSpec((TB_cell, P_pad, E), lambda b: (b, 0, 0)),   # img
        pl.BlockSpec((TB_cell, EMB), lambda b: (b, 0)),           # word features
        cspec((1, P_pad)),            # pixel pad mask
        cspec((E, 2 * D)),            # [init_h | init_c] weight (bf16)
        cspec((1, 2 * D)),            # [init_h | init_c] bias
        cspec((E, A)),                # encoder_att weight (bf16)
        cspec((1, A)),                # encoder_att bias
        cspec((1, A)),                # full_att weight
        cspec((D, HP)),               # [dec_att | f_beta | w_hh] (bf16)
        cspec((1, HP)),               # fused bias (b_ih folded in)
        cspec((EMB, 4 * D)),          # w_ih word half (bf16)
        cspec((E, 4 * D)),            # w_ih awe half (bf16)
    ]
    cell_out_specs = (
        pl.BlockSpec((TB_cell, D), lambda b: (b, 0)),             # h
        pl.BlockSpec((TB_cell, D), lambda b: (b, 0)),             # c
    )
    cell_out_shape = (
        jax.ShapeDtypeStruct((B_pad, D), jnp.float32),
        jax.ShapeDtypeStruct((B_pad, D), jnp.float32),
    )
    cell_consts = ((E * 2 * D + E * A + D * HP + EMB * 4 * D + E * 4 * D) * bf16b
                   + (P_pad + 2 * D + 2 * A + HP) * f32b)
    cell_est = (2 * (TB_cell * P_pad * E + TB_cell * EMB) * f32b   # pipelined activations
                + cell_consts                                      # single-buffered weights
                + 2 * 2 * TB_cell * D * f32b                       # h / c output buffers
                + 4 * TB_cell * P_pad * max(A, E) * f32b)          # in-kernel temporaries

    h_pad, c_pad = pl.pallas_call(
        _make_cell_kernel(D=D, A=A, E=E, inv_num_pixels=1.0 / P),
        out_shape=cell_out_shape,
        grid_spec=pltpu.PrefetchScalarGridSpec(
            num_scalar_prefetch=0,
            grid=(B_pad // TB_cell,),
            in_specs=cell_in_specs,
            out_specs=cell_out_specs),
        compiler_params=pltpu.CompilerParams(
            dimension_semantics=("parallel",),
            vmem_limit_bytes=_vmem_limit(cell_est)),
    )(img, wf, pmask, init_hc_w, init_hc_b, enc_w, p["enc_b"], p["full_w"],
      h_proj_w, h_proj_b, w_ih_wf, w_ih_awe)

    # ============== kernel 2: fc + online logsumexp + log_softmax ============
    fc_in_specs = [
        pl.BlockSpec((TB_fc, D), lambda b, v: (b, 0)),            # h
        pl.BlockSpec((D, TV), lambda b, v: (0, v)),               # fc_w (bf16), streamed
        pl.BlockSpec((1, TV), lambda b, v: (0, v)),               # fc_b, streamed
    ]
    fc_out_specs = (
        pl.BlockSpec((TB_fc, TV), lambda b, v: (b, v)),           # logits, streamed
        pl.BlockSpec((TB_fc, V_pad), lambda b, v: (b, 0)),        # log_probs, resident
    )
    fc_out_shape = (
        jax.ShapeDtypeStruct((B_pad, V_pad), jnp.float32),
        jax.ShapeDtypeStruct((B_pad, V_pad), jnp.float32),
    )
    fc_est = (2 * (TB_fc * D * f32b + D * TV * bf16b + TV * f32b + TB_fc * TV * f32b)
              + 2 * TB_fc * V_pad * f32b          # resident log_probs output block
              + TB_fc * V_pad * f32b              # staged raw logits (scratch)
              + 2 * TB_fc * f32b                  # m / s scratch
              + 2 * TB_fc * TV * f32b)            # exp temporaries

    logits_pad, log_probs_pad = pl.pallas_call(
        _make_fc_kernel(TV, NV),
        out_shape=fc_out_shape,
        grid_spec=pltpu.PrefetchScalarGridSpec(
            num_scalar_prefetch=0,
            grid=(B_pad // TB_fc, NV),
            in_specs=fc_in_specs,
            out_specs=fc_out_specs,
            scratch_shapes=[
                pltpu.VMEM((TB_fc, 1), jnp.float32),       # running max
                pltpu.VMEM((TB_fc, 1), jnp.float32),       # running (rescaled) sum
                pltpu.VMEM((NV, TB_fc, TV), jnp.float32),  # staged raw logits
            ]),
        compiler_params=pltpu.CompilerParams(
            dimension_semantics=("parallel", "arbitrary"),
            vmem_limit_bytes=_vmem_limit(fc_est)),
    )(h_pad, fc_w, fc_b)

    return (log_probs_pad[:B, :V], logits_pad[:B, :V], h_pad[:B], c_pad[:B])


# ---------------------------- pure-JAX reference ----------------------------- #
def reference_forward(tokens, img_nchw, p):
    B, E, H, W = img_nchw.shape
    img = jnp.transpose(img_nchw, (0, 2, 3, 1)).reshape(B, -1, E)
    wf = p["embedding"][tokens]
    feat_mean = img.mean(axis=1)
    h0 = feat_mean @ p["init_h_w"] + p["init_h_b"][0]
    c0 = feat_mean @ p["init_c_w"] + p["init_c_b"][0]
    att1 = img @ p["enc_w"] + p["enc_b"][0]
    att2 = h0 @ p["dec_w"] + p["dec_b"][0]
    e = jax.nn.relu(att1 + att2[:, None, :])
    att = (e * p["full_w"][0]).sum(-1) + p["full_b"][0, 0]
    alpha = jax.nn.softmax(att, axis=1)
    awe = (img * alpha[:, :, None]).sum(1)
    gate = jax.nn.sigmoid(h0 @ p["f_beta_w"] + p["f_beta_b"][0])
    awe = gate * awe
    gates = (wf @ p["w_ih_wf"] + awe @ p["w_ih_awe"] + p["b_ih"][0]
             + h0 @ p["w_hh"] + p["b_hh"][0])
    D = h0.shape[1]
    i = jax.nn.sigmoid(gates[:, :D])
    f = jax.nn.sigmoid(gates[:, D:2 * D])
    g = jnp.tanh(gates[:, 2 * D:3 * D])
    o = jax.nn.sigmoid(gates[:, 3 * D:])
    c = f * c0 + i * g
    h = o * jnp.tanh(c)
    logits = h @ p["fc_w"] + p["fc_b"][0]
    log_probs = jax.nn.log_softmax(logits, axis=1)
    return log_probs, logits, h, c


# ------------------------------ params / main -------------------------------- #
def make_params(key, *, E, A, EMB, D, V):
    names_shapes = [
        ("embedding", (V, EMB)),
        ("enc_w", (E, A)), ("enc_b", (1, A)),
        ("dec_w", (D, A)), ("dec_b", (1, A)),
        ("full_w", (1, A)), ("full_b", (1, 1)),
        ("init_h_w", (E, D)), ("init_h_b", (1, D)),
        ("init_c_w", (E, D)), ("init_c_b", (1, D)),
        ("f_beta_w", (D, E)), ("f_beta_b", (1, E)),
        ("w_ih_wf", (EMB, 4 * D)), ("w_ih_awe", (E, 4 * D)), ("b_ih", (1, 4 * D)),
        ("w_hh", (D, 4 * D)), ("b_hh", (1, 4 * D)),
        ("fc_w", (D, V)), ("fc_b", (1, V)),
    ]
    params = {}
    keys = jax.random.split(key, len(names_shapes))
    for k, (name, shape) in zip(keys, names_shapes):
        params[name] = jax.random.uniform(k, shape, jnp.float32, -0.1, 0.1)
    return params


if __name__ == "__main__":
    # Small shapes that still exercise the real tiling: B=10 pads to 16 with
    # cell_batch_tile=8 (2 cell batch tiles), P=5*5=25 pads to 32 (masked
    # pixel softmax), V=300 pads to 384 with vocab_tile=128 (3 streamed vocab
    # tiles + online logsumexp + in-kernel log_softmax), one fc batch tile
    # (single HBM pass over fc_w).
    B, E, A, EMB, D, V, H, W = 10, 32, 32, 16, 32, 300, 5, 5

    root = jax.random.PRNGKey(0)
    kp, kt, ki = jax.random.split(root, 3)
    params = make_params(kp, E=E, A=A, EMB=EMB, D=D, V=V)
    tokens = jax.random.randint(kt, (B,), 0, V, dtype=jnp.int32)
    img = jax.random.normal(ki, (B, E, H, W), dtype=jnp.float32)

    outs = decoder_att_cell(tokens, img, params,
                            cell_batch_tile=8, vocab_tile=128)
    jax.block_until_ready(outs)

    refs = reference_forward(tokens, img, params)
    names = ("log_probs", "logits", "h", "c")
    for name, got, ref in zip(names, outs, refs):
        assert got.shape == ref.shape and got.dtype == ref.dtype, name
        # 1e-2 tolerance: bf16 weights (f32 accumulation) + EUP approximate
        # reciprocal in the pixel softmax.
        assert jnp.allclose(got, ref, atol=1e-2, rtol=1e-2), f"mismatch in {name}"

    print("KERNEL_OK")
</pallas_src>

<mosaic_0001>
module attributes {stable_mosaic.version = 11 : i64} {
  func.func @kernel(%arg0: i32, %arg1: memref<8x32x32xf32, #tpu.memory_space<vmem>>, %arg2: memref<8x16xf32, #tpu.memory_space<vmem>>, %arg3: memref<1x32xf32, #tpu.memory_space<vmem>>, %arg4: memref<32x64xbf16, #tpu.memory_space<vmem>>, %arg5: memref<1x64xf32, #tpu.memory_space<vmem>>, %arg6: memref<32x32xbf16, #tpu.memory_space<vmem>>, %arg7: memref<1x32xf32, #tpu.memory_space<vmem>>, %arg8: memref<1x32xf32, #tpu.memory_space<vmem>>, %arg9: memref<32x192xbf16, #tpu.memory_space<vmem>>, %arg10: memref<1x192xf32, #tpu.memory_space<vmem>>, %arg11: memref<16x128xbf16, #tpu.memory_space<vmem>>, %arg12: memref<32x128xbf16, #tpu.memory_space<vmem>>, %arg13: memref<8x32xf32, #tpu.memory_space<vmem>>, %arg14: memref<8x32xf32, #tpu.memory_space<vmem>>) attributes {dimension_semantics = [#tpu.dimension_semantics<parallel>], iteration_bounds = array<i64: 2>, scalar_prefetch = 0 : i64, scratch_operands = 0 : i64, tpu.core_type = #tpu.core_type<tc>, window_params = [{transform_indices = @transform_0, window_bounds = array<i64: 8, 32, 32>}, {transform_indices = @transform_1, window_bounds = array<i64: 8, 16>}, {pipeline_mode = #tpu.pipeline_mode<synchronous>, transform_indices = @transform_2, window_bounds = array<i64: 1, 32>}, {pipeline_mode = #tpu.pipeline_mode<synchronous>, transform_indices = @transform_3, window_bounds = array<i64: 32, 64>}, {pipeline_mode = #tpu.pipeline_mode<synchronous>, transform_indices = @transform_4, window_bounds = array<i64: 1, 64>}, {pipeline_mode = #tpu.pipeline_mode<synchronous>, transform_indices = @transform_5, window_bounds = array<i64: 32, 32>}, {pipeline_mode = #tpu.pipeline_mode<synchronous>, transform_indices = @transform_6, window_bounds = array<i64: 1, 32>}, {pipeline_mode = #tpu.pipeline_mode<synchronous>, transform_indices = @transform_7, window_bounds = array<i64: 1, 32>}, {pipeline_mode = #tpu.pipeline_mode<synchronous>, transform_indices = @transform_8, window_bounds = array<i64: 32, 192>}, {pipeline_mode = #tpu.pipeline_mode<synchronous>, transform_indices = @transform_9, window_bounds = array<i64: 1, 192>}, {pipeline_mode = #tpu.pipeline_mode<synchronous>, transform_indices = @transform_10, window_bounds = array<i64: 16, 128>}, {pipeline_mode = #tpu.pipeline_mode<synchronous>, transform_indices = @transform_11, window_bounds = array<i64: 32, 128>}, {transform_indices = @transform_12, window_bounds = array<i64: 8, 32>}, {transform_indices = @transform_13, window_bounds = array<i64: 8, 32>}]} {
    %c0 = arith.constant 0 : index
    %c0_0 = arith.constant 0 : index
    %c0_1 = arith.constant 0 : index
    %0 = vector.load %arg1[%c0, %c0_0, %c0_1] : memref<8x32x32xf32, #tpu.memory_space<vmem>>, vector<8x32x32xf32>
    %1 = arith.truncf %0 : vector<8x32x32xf32> to vector<8x32x32xbf16>
    %c0_2 = arith.constant 0 : index
    %c0_3 = arith.constant 0 : index
    %2 = vector.load %arg2[%c0_2, %c0_3] : memref<8x16xf32, #tpu.memory_space<vmem>>, vector<8x16xf32>
    %3 = arith.truncf %2 : vector<8x16xf32> to vector<8x16xbf16>
    %cst = arith.constant dense<0.000000e+00> : vector<8x32xf32>
    %4 = vector.multi_reduction <add>, %0, %cst [1] : vector<8x32x32xf32> to vector<8x32xf32>
    %cst_4 = arith.constant 4.000000e-02 : f32
    %5 = vector.broadcast %cst_4 : f32 to vector<8x32xf32>
    %6 = arith.mulf %4, %5 : vector<8x32xf32>
    %7 = arith.truncf %6 : vector<8x32xf32> to vector<8x32xbf16>
    %c0_5 = arith.constant 0 : index
    %c0_6 = arith.constant 0 : index
    %8 = vector.load %arg4[%c0_5, %c0_6] : memref<32x64xbf16, #tpu.memory_space<vmem>>, vector<32x64xbf16>
    %cst_7 = arith.constant dense<0.000000e+00> : vector<8x64xf32>
    %9 = tpu.matmul %7, %8, %cst_7 {dimension_numbers = #tpu.dot_dimension_numbers<[1], [0], [0], [1], [0, 0, 1, 1], [], []>} : vector<8x32xbf16>, vector<32x64xbf16>, vector<8x64xf32> -> vector<8x64xf32>
    %c0_8 = arith.constant 0 : index
    %c0_9 = arith.constant 0 : index
    %10 = vector.load %arg5[%c0_8, %c0_9] : memref<1x64xf32, #tpu.memory_space<vmem>>, vector<1x64xf32>
    %11 = vector.broadcast %10 : vector<1x64xf32> to vector<8x64xf32>
    %12 = arith.addf %9, %11 : vector<8x64xf32>
    %13 = vector.extract_strided_slice %12 {offsets = [0, 0], sizes = [8, 32], strides = [1, 1]} : vector<8x64xf32> to vector<8x32xf32>
    %14 = vector.extract_strided_slice %12 {offsets = [0, 32], sizes = [8, 32], strides = [1, 1]} : vector<8x64xf32> to vector<8x32xf32>
    %15 = vector.shape_cast %1 : vector<8x32x32xbf16> to vector<256x32xbf16>
    %c0_10 = arith.constant 0 : index
    %c0_11 = arith.constant 0 : index
    %16 = vector.load %arg6[%c0_10, %c0_11] : memref<32x32xbf16, #tpu.memory_space<vmem>>, vector<32x32xbf16>
    %cst_12 = arith.constant dense<0.000000e+00> : vector<256x32xf32>
    %17 = tpu.matmul %15, %16, %cst_12 {dimension_numbers = #tpu.dot_dimension_numbers<[1], [0], [0], [1], [0, 0, 1, 1], [], []>} : vector<256x32xbf16>, vector<32x32xbf16>, vector<256x32xf32> -> vector<256x32xf32>
    %c0_13 = arith.constant 0 : index
    %c0_14 = arith.constant 0 : index
    %18 = vector.load %arg7[%c0_13, %c0_14] : memref<1x32xf32, #tpu.memory_space<vmem>>, vector<1x32xf32>
    %19 = vector.broadcast %18 : vector<1x32xf32> to vector<256x32xf32>
    %20 = arith.addf %17, %19 : vector<256x32xf32>
    %21 = arith.truncf %13 : vector<8x32xf32> to vector<8x32xbf16>
    %c0_15 = arith.constant 0 : index
    %c0_16 = arith.constant 0 : index
    %22 = vector.load %arg9[%c0_15, %c0_16] : memref<32x192xbf16, #tpu.memory_space<vmem>>, vector<32x192xbf16>
    %cst_17 = arith.constant dense<0.000000e+00> : vector<8x192xf32>
    %23 = tpu.matmul %21, %22, %cst_17 {dimension_numbers = #tpu.dot_dimension_numbers<[1], [0], [0], [1], [0, 0, 1, 1], [], []>} : vector<8x32xbf16>, vector<32x192xbf16>, vector<8x192xf32> -> vector<8x192xf32>
    %c0_18 = arith.constant 0 : index
    %c0_19 = arith.constant 0 : index
    %24 = vector.load %arg10[%c0_18, %c0_19] : memref<1x192xf32, #tpu.memory_space<vmem>>, vector<1x192xf32>
    %25 = vector.broadcast %24 : vector<1x192xf32> to vector<8x192xf32>
    %26 = arith.addf %23, %25 : vector<8x192xf32>
    %27 = vector.extract_strided_slice %26 {offsets = [0, 0], sizes = [8, 32], strides = [1, 1]} : vector<8x192xf32> to vector<8x32xf32>
    %28 = vector.extract_strided_slice %26 {offsets = [0, 32], sizes = [8, 32], strides = [1, 1]} : vector<8x192xf32> to vector<8x32xf32>
    %29 = vector.extract_strided_slice %26 {offsets = [0, 64], sizes = [8, 128], strides = [1, 1]} : vector<8x192xf32> to vector<8x128xf32>
    %30 = vector.shape_cast %20 : vector<256x32xf32> to vector<8x32x32xf32>
    %31 = vector.shape_cast %27 : vector<8x32xf32> to vector<8x1x32xf32>
    %32 = vector.broadcast %31 : vector<8x1x32xf32> to vector<8x32x32xf32>
    %33 = arith.addf %30, %32 : vector<8x32x32xf32>
    %cst_20 = arith.constant 0.000000e+00 : f32
    %34 = vector.broadcast %cst_20 : f32 to vector<8x32x32xf32>
    %35 = arith.maximumf %33, %34 : vector<8x32x32xf32>
    %c0_21 = arith.constant 0 : index
    %c0_22 = arith.constant 0 : index
    %36 = vector.load %arg8[%c0_21, %c0_22] : memref<1x32xf32, #tpu.memory_space<vmem>>, vector<1x32xf32>
    %37 = vector.shape_cast %36 : vector<1x32xf32> to vector<1x1x32xf32>
    %38 = vector.broadcast %37 : vector<1x1x32xf32> to vector<8x32x32xf32>
    %39 = arith.mulf %35, %38 : vector<8x32x32xf32>
    %cst_23 = arith.constant dense<0.000000e+00> : vector<8x32xf32>
    %40 = vector.multi_reduction <add>, %39, %cst_23 [2] : vector<8x32x32xf32> to vector<8x32xf32>
    %c0_24 = arith.constant 0 : index
    %c0_25 = arith.constant 0 : index
    %41 = vector.load %arg3[%c0_24, %c0_25] : memref<1x32xf32, #tpu.memory_space<vmem>>, vector<1x32xf32>
    %42 = vector.broadcast %41 : vector<1x32xf32> to vector<8x32xf32>
    %43 = arith.addf %40, %42 : vector<8x32xf32>
    %cst_26 = arith.constant dense<0xFF800000> : vector<8xf32>
    %44 = vector.multi_reduction <maximumf>, %43, %cst_26 [1] : vector<8x32xf32> to vector<8xf32>
    %45 = vector.shape_cast %44 : vector<8xf32> to vector<8x1xf32>
    %46 = vector.broadcast %45 : vector<8x1xf32> to vector<8x32xf32>
    %47 = arith.subf %43, %46 : vector<8x32xf32>
    %48 = math.exp %47 : vector<8x32xf32>
    %cst_27 = arith.constant dense<0.000000e+00> : vector<8xf32>
    %49 = vector.multi_reduction <add>, %48, %cst_27 [1] : vector<8x32xf32> to vector<8xf32>
    %50 = vector.shape_cast %49 : vector<8xf32> to vector<8x1xf32>
    %51 = tpu.reciprocal %50 {approx = true} : vector<8x1xf32> -> vector<8x1xf32>
    %52 = vector.broadcast %51 : vector<8x1xf32> to vector<8x32xf32>
    %53 = arith.mulf %48, %52 : vector<8x32xf32>
    %54 = vector.shape_cast %53 : vector<8x32xf32> to vector<8x1x32xf32>
    "tpu.trace_start"() <{level = 10 : i32, message = "bqp,bpe->bqe"}> : () -> ()
    %cst_28 = arith.constant dense<0.000000e+00> : vector<8x1x32xf32>
    %55 = tpu.matmul %54, %0, %cst_28 {dimension_numbers = #tpu.dot_dimension_numbers<[2], [1], [1], [2], [0, 0, 0, 1, 1, 2], [0], [0]>} : vector<8x1x32xf32>, vector<8x32x32xf32>, vector<8x1x32xf32> -> vector<8x1x32xf32>
    "tpu.trace_stop"() : () -> ()
    %56 = vector.shape_cast %55 : vector<8x1x32xf32> to vector<8x32xf32>
    %57 = arith.negf %28 : vector<8x32xf32>
    %58 = math.exp %57 : vector<8x32xf32>
    %cst_29 = arith.constant 1.000000e+00 : f32
    %59 = vector.broadcast %cst_29 : f32 to vector<8x32xf32>
    %60 = arith.addf %59, %58 : vector<8x32xf32>
    %61 = arith.divf %59, %60 : vector<8x32xf32>
    %62 = arith.mulf %61, %56 : vector<8x32xf32>
    %c0_30 = arith.constant 0 : index
    %c0_31 = arith.constant 0 : index
    %63 = vector.load %arg11[%c0_30, %c0_31] : memref<16x128xbf16, #tpu.memory_space<vmem>>, vector<16x128xbf16>
    %cst_32 = arith.constant dense<0.000000e+00> : vector<8x128xf32>
    %64 = tpu.matmul %3, %63, %cst_32 {dimension_numbers = #tpu.dot_dimension_numbers<[1], [0], [0], [1], [0, 0, 1, 1], [], []>} : vector<8x16xbf16>, vector<16x128xbf16>, vector<8x128xf32> -> vector<8x128xf32>
    %65 = arith.truncf %62 : vector<8x32xf32> to vector<8x32xbf16>
    %c0_33 = arith.constant 0 : index
    %c0_34 = arith.constant 0 : index
    %66 = vector.load %arg12[%c0_33, %c0_34] : memref<32x128xbf16, #tpu.memory_space<vmem>>, vector<32x128xbf16>
    %cst_35 = arith.constant dense<0.000000e+00> : vector<8x128xf32>
    %67 = tpu.matmul %65, %66, %cst_35 {dimension_numbers = #tpu.dot_dimension_numbers<[1], [0], [0], [1], [0, 0, 1, 1], [], []>} : vector<8x32xbf16>, vector<32x128xbf16>, vector<8x128xf32> -> vector<8x128xf32>
    %68 = arith.addf %64, %67 : vector<8x128xf32>
    %69 = arith.addf %68, %29 : vector<8x128xf32>
    %70 = vector.extract_strided_slice %69 {offsets = [0, 0], sizes = [8, 32], strides = [1, 1]} : vector<8x128xf32> to vector<8x32xf32>
    %71 = arith.negf %70 : vector<8x32xf32>
    %72 = math.exp %71 : vector<8x32xf32>
    %cst_36 = arith.constant 1.000000e+00 : f32
    %73 = vector.broadcast %cst_36 : f32 to vector<8x32xf32>
    %74 = arith.addf %73, %72 : vector<8x32xf32>
    %75 = arith.divf %73, %74 : vector<8x32xf32>
    %76 = vector.extract_strided_slice %69 {offsets = [0, 32], sizes = [8, 32], strides = [1, 1]} : vector<8x128xf32> to vector<8x32xf32>
    %77 = arith.negf %76 : vector<8x32xf32>
    %78 = math.exp %77 : vector<8x32xf32>
    %cst_37 = arith.constant 1.000000e+00 : f32
    %79 = vector.broadcast %cst_37 : f32 to vector<8x32xf32>
    %80 = arith.addf %79, %78 : vector<8x32xf32>
    %81 = arith.divf %79, %80 : vector<8x32xf32>
    %82 = vector.extract_strided_slice %69 {offsets = [0, 64], sizes = [8, 32], strides = [1, 1]} : vector<8x128xf32> to vector<8x32xf32>
    %83 = math.tanh %82 : vector<8x32xf32>
    %84 = vector.extract_strided_slice %69 {offsets = [0, 96], sizes = [8, 32], strides = [1, 1]} : vector<8x128xf32> to vector<8x32xf32>
    %85 = arith.negf %84 : vector<8x32xf32>
    %86 = math.exp %85 : vector<8x32xf32>
    %cst_38 = arith.constant 1.000000e+00 : f32
    %87 = vector.broadcast %cst_38 : f32 to vector<8x32xf32>
    %88 = arith.addf %87, %86 : vector<8x32xf32>
    %89 = arith.divf %87, %88 : vector<8x32xf32>
    %90 = arith.mulf %81, %14 : vector<8x32xf32>
    %91 = arith.mulf %75, %83 : vector<8x32xf32>
    %92 = arith.addf %90, %91 : vector<8x32xf32>
    %93 = math.tanh %92 : vector<8x32xf32>
    %94 = arith.mulf %89, %93 : vector<8x32xf32>
    %c0_39 = arith.constant 0 : index
    %c0_40 = arith.constant 0 : index
    %95 = vector.load %arg13[%c0_39, %c0_40] : memref<8x32xf32, #tpu.memory_space<vmem>>, vector<8x32xf32>
    tpu.vector_store %arg13[%c0_39, %c0_40], %94 {strides = array<i32>} : memref<8x32xf32, #tpu.memory_space<vmem>>, vector<8x32xf32>,
    %c0_41 = arith.constant 0 : index
    %c0_42 = arith.constant 0 : index
    %96 = vector.load %arg14[%c0_41, %c0_42] : memref<8x32xf32, #tpu.memory_space<vmem>>, vector<8x32xf32>
    tpu.vector_store %arg14[%c0_41, %c0_42], %92 {strides = array<i32>} : memref<8x32xf32, #tpu.memory_space<vmem>>, vector<8x32xf32>,
    return
  }
  func.func @transform_0(%arg0: i32) -> (i32, i32, i32) {
    %c0_i32 = arith.constant 0 : i32
    %c0_i32_0 = arith.constant 0 : i32
    %c0_i32_1 = arith.constant 0 : i32
    return %arg0, %c0_i32, %c0_i32_0 : i32, i32, i32
  }
  func.func @transform_1(%arg0: i32) -> (i32, i32) {
    %c0_i32 = arith.constant 0 : i32
    %c0_i32_0 = arith.constant 0 : i32
    return %arg0, %c0_i32 : i32, i32
  }
  func.func @transform_2(%arg0: i32) -> (i32, i32) {
    %c0_i32 = arith.constant 0 : i32
    %c0_i32_0 = arith.constant 0 : i32
    %c0_i32_1 = arith.constant 0 : i32
    return %c0_i32, %c0_i32_0 : i32, i32
  }
  func.func @transform_3(%arg0: i32) -> (i32, i32) {
    %c0_i32 = arith.constant 0 : i32
    %c0_i32_0 = arith.constant 0 : i32
    %c0_i32_1 = arith.constant 0 : i32
    return %c0_i32, %c0_i32_0 : i32, i32
  }
  func.func @transform_4(%arg0: i32) -> (i32, i32) {
    %c0_i32 = arith.constant 0 : i32
    %c0_i32_0 = arith.constant 0 : i32
    %c0_i32_1 = arith.constant 0 : i32
    return %c0_i32, %c0_i32_0 : i32, i32
  }
  func.func @transform_5(%arg0: i32) -> (i32, i32) {
    %c0_i32 = arith.constant 0 : i32
    %c0_i32_0 = arith.constant 0 : i32
    %c0_i32_1 = arith.constant 0 : i32
    return %c0_i32, %c0_i32_0 : i32, i32
  }
  func.func @transform_6(%arg0: i32) -> (i32, i32) {
    %c0_i32 = arith.constant 0 : i32
    %c0_i32_0 = arith.constant 0 : i32
    %c0_i32_1 = arith.constant 0 : i32
    return %c0_i32, %c0_i32_0 : i32, i32
  }
  func.func @transform_7(%arg0: i32) -> (i32, i32) {
    %c0_i32 = arith.constant 0 : i32
    %c0_i32_0 = arith.constant 0 : i32
    %c0_i32_1 = arith.constant 0 : i32
    return %c0_i32, %c0_i32_0 : i32, i32
  }
  func.func @transform_8(%arg0: i32) -> (i32, i32) {
    %c0_i32 = arith.constant 0 : i32
    %c0_i32_0 = arith.constant 0 : i32
    %c0_i32_1 = arith.constant 0 : i32
    return %c0_i32, %c0_i32_0 : i32, i32
  }
  func.func @transform_9(%arg0: i32) -> (i32, i32) {
    %c0_i32 = arith.constant 0 : i32
    %c0_i32_0 = arith.constant 0 : i32
    %c0_i32_1 = arith.constant 0 : i32
    return %c0_i32, %c0_i32_0 : i32, i32
  }
  func.func @transform_10(%arg0: i32) -> (i32, i32) {
    %c0_i32 = arith.constant 0 : i32
    %c0_i32_0 = arith.constant 0 : i32
    %c0_i32_1 = arith.constant 0 : i32
    return %c0_i32, %c0_i32_0 : i32, i32
  }
  func.func @transform_11(%arg0: i32) -> (i32, i32) {
    %c0_i32 = arith.constant 0 : i32
    %c0_i32_0 = arith.constant 0 : i32
    %c0_i32_1 = arith.constant 0 : i32
    return %c0_i32, %c0_i32_0 : i32, i32
  }
  func.func @transform_12(%arg0: i32) -> (i32, i32) {
    %c0_i32 = arith.constant 0 : i32
    %c0_i32_0 = arith.constant 0 : i32
    return %arg0, %c0_i32 : i32, i32
  }
  func.func @transform_13(%arg0: i32) -> (i32, i32) {
    %c0_i32 = arith.constant 0 : i32
    %c0_i32_0 = arith.constant 0 : i32
    return %arg0, %c0_i32 : i32, i32
  }
}

</mosaic_0001>

<bundles_post_ra>
// kernel: tpu_custom_call.1
= control target key start
LH: loop header
LB: loop body
LE: loop exit
PB: predicated region body
PF: predicated region fallthrough
CT: control target
= control target key end

     0   :  { %s5035_s0 = inlined_call_operand.hbm [shape: f32[16,32,32], index: 0, kind: input, shape index: {}]   ;;  %s5036_s1 = inlined_call_operand.hbm [shape: f32[16,16], index: 1, kind: input, shape index: {}]   ;;  %s5037_s2 = inlined_call_operand.vmem [shape: f32[1,32], index: 2, kind: input, shape index: {}]   ;;  %s5038_s3 = inlined_call_operand.hbm [shape: bf16[32,64], index: 3, kind: input, shape index: {}]   ;;  %s5039_s4 = inlined_call_operand.hbm [shape: f32[1,64], index: 4, kind: input, shape index: {}]   ;;  %s5040_s5 = inlined_call_operand.hbm [shape: bf16[32,32], index: 5, kind: input, shape index: {}]   ;;  %s5041_s6 = inlined_call_operand.hbm [shape: f32[1,32], index: 6, kind: input, shape index: {}]   ;;  %s5042_s7 = inlined_call_operand.hbm [shape: f32[1,32], index: 7, kind: input, shape index: {}]   ;;  %s5043_s8 = inlined_call_operand.hbm [shape: bf16[32,192], index: 8, kind: input, shape index: {}]   ;;  %s5044_s9 = inlined_call_operand.hbm [shape: f32[1,192], index: 9, kind: input, shape index: {}]   ;;  %s5045_s10 = inlined_call_operand.vmem [shape: bf16[16,128], index: 10, kind: input, shape index: {}]   ;;  %s5046_s11 = inlined_call_operand.hbm [shape: bf16[32,128], index: 11, kind: input, shape index: {}]   ;;  %s5047_s12 = inlined_call_operand.hbm [shape: f32[16,32], index: 12, kind: output, shape index: {0}]   ;;  %s5048_s13 = inlined_call_operand.hbm [shape: f32[16,32], index: 13, kind: output, shape index: {1}]  }
   0x1   :  { %5061 = sst [smem:[#allocation40_spill]] %s5038_s3 }
   0x2   :  { %5062 = sst [smem:[#allocation41_spill]] %s5039_s4 }
   0x3   :  { %5063 = sst [smem:[#allocation42_spill]] %s5040_s5 }
   0x4   :  { %5064 = sst [smem:[#allocation43_spill]] %s5041_s6 }
   0x5   :  { %5065 = sst [smem:[#allocation44_spill]] %s5042_s7 }
   0x6   :  { %5066 = sst [smem:[#allocation45_spill]] %s5043_s8 }
   0x7   :  { %5067 = sst [smem:[#allocation46_spill]] %s5044_s9 }
   0x8   :  { %5068 = sst [smem:[#allocation47_spill]] %s5046_s11 }
   0x9   :  { %5069 = sst [smem:[#allocation48_spill]] %s5047_s12 }
   0xa   :  { %5070 = sst [smem:[#allocation49_spill]] %s5048_s13 }
   0xb   :  { %19 = vsyncpa [#allocation3], 0 }
   0xc   :  { %21 = vsyncpa [#allocation3 + $0x1], 0 }
   0xd   :  { %22 = vsyncpa [#allocation6], 0 }
   0xe   :  { %24 = vsyncpa [#allocation6 + $0x1], 0 }
   0xf   :  { %25 = vsyncpa [#allocation9], 0 }
  0x10   :  { %26 = vsyncpa [#allocation12], 0 }
  0x11   :  { %27 = vsyncpa [#allocation15], 0 }
  0x12   :  { %28 = vsyncpa [#allocation18], 0 }
  0x13   :  { %29 = vsyncpa [#allocation4], 0 }
  0x14   :  { %31 = vsyncpa [#allocation4 + $0x1], 0 }
  0x15   :  { %32 = vsyncpa [#allocation21], 0 }
  0x16   :  { %34 = vsyncpa [#allocation21 + $0x1], 0  ;;  %s3674_s25 = smov 0   ;;  %s3676_s26 = smov 0  }
  0x17   :  { %s3678_s27 = smov 0   ;;  %s3680_s28 = smov 0  }
  0x18 LB: > { %5071 = sst [smem:[#allocation31_spill]] %s3582_s27  ;;  %s3698_s15 = sadd.s32 4294967295, %s3586_s28   ;;  %s3586_s28 = sphi %s3680_s28, %s5111_s28   ;;  %s3582_s27 = sphi %s3678_s27, %s5108_s27   ;;  %s3578_s26 = sphi %s3676_s26, %s5110_s26   ;;  %s3574_s25 = sphi %s3674_s25, %s5109_s25  }
  0x19   : > { %s5072_s3 = sld [smem:[#allocation40_spill]]  ;;  %p2793_p0 = scmp.ge.s32.totalorder %s3586_s28, 1 }
  0x1a   : > { %p61_p1 = scmp.eq.s32.totalorder %s3698_s15, 0  ;;  %p359_p2 = scmp.lt.s32.totalorder %s3586_s28, 3 }
  0x1b   : > { %s3588_s17 = smov [#allocation7]   ;;  %s5074_s4 = sld [smem:[#allocation41_spill]] }
  0x1c   : > { %p3703_p3 = pnand %p2793_p0, %p359_p2  ;;  %s375_s18 = sshll.u32 %s3588_s17, 4  ;;  %s376_s18 = int_to_ptr.vmem [resolvable:$true] %s375_s18 }
  0x1d   : > { %s5076_s6 = sld [smem:[#allocation43_spill]]  ;;  %s3589_s30 = smov [#allocation8]  }
  0x1e   : > { %p2962_p4 = pneg %p3703_p3  ;;  %s390_s17 = sshll.u32 %s3589_s30, 4  ;;  %s391_s17 = int_to_ptr.vmem [resolvable:$true] %s390_s17 }
  0x1f   : > { %s373_s14 = sshll.u32 %s5072_s3, 4  ;;  %s3590_s3 = smov 64   ;;  %s374_s14 = int_to_ptr.hbm [resolvable:$true] %s373_s14 }
  0x20   : > { %p3715_p6 = pnand %p2962_p4, %p61_p1  ;;  %s3591_s12 = smov 4  }
  0x21   : > { %s388_s21 = sshll.u32 %s5074_s4, 4  ;;  %s5077_s8 = sld [smem:[#allocation45_spill]]  ;;  %s389_s21 = int_to_ptr.hbm [resolvable:$true] %s388_s21 }
  0x22   : > { %2965 = dma.hbm_to_vmem [thread:$0]  (!%p3715_p6), %s374_s14, 256, %s376_s18, [#allocation6], %s3590_s3, %s3590_s3, %s3591_s12  }
  0x23   : > { %s414_s29 = sshll.u32 %s5076_s6, 4  ;;  %s3592_s23 = smov [#allocation11]   ;;  %s415_s29 = int_to_ptr.hbm [resolvable:$true] %s414_s29 }
  0x24   : > { %2968 = dma.hbm_to_vmem [thread:$0]  (!%p3715_p6), %s389_s21, 16, %s391_s17, [#allocation9]  }
  0x25   : > { %s416_s24 = sshll.u32 %s3592_s23, 4  ;;  %s3593_s30 = smov [#allocation14]   ;;  %s417_s24 = int_to_ptr.vmem [resolvable:$true] %s416_s24 }
  0x26   : > { %2974 = dma.hbm_to_vmem [thread:$0]  (!%p3715_p6), %s415_s29, 16, %s417_s24, [#allocation12]  }
  0x27   : > { %s437_s4 = sshll.u32 %s5077_s8, 4  ;;  %s439_s6 = sshll.u32 %s3593_s30, 4  ;;  %s438_s4 = int_to_ptr.hbm [resolvable:$true] %s437_s4  ;;  %s440_s6 = int_to_ptr.vmem [resolvable:$true] %s439_s6 }
  0x28   : > { %s5051_s13 = smov 128   ;;  %s5052_s14 = smov 8  }
  0x29   : > { %2980 = dma.hbm_to_vmem [thread:$0]  (!%p3715_p6), %s438_s4, 512, %s440_s6, [#allocation15], %s5051_s13, %s5051_s13, %s5052_s14  }
  0x2a   : > { %s5078_s5 = sld [smem:[#allocation42_spill]]  ;;  %s3596_s19 = smov [#allocation10]  }
  0x2b   : > { %s401_s20 = sshll.u32 %s3596_s19, 4  ;;  %s5079_s7 = sld [smem:[#allocation44_spill]]  ;;  %s402_s20 = int_to_ptr.vmem [resolvable:$true] %s401_s20 }
  0x2c   : > { %s3597_s4 = smov [#allocation13]   ;;  %s5080_s9 = sld [smem:[#allocation46_spill]] }
  0x2d   : > { %s428_s6 = sshll.u32 %s3597_s4, 4  ;;  %s5081_s11 = sld [smem:[#allocation47_spill]]  ;;  %s429_s6 = int_to_ptr.vmem [resolvable:$true] %s428_s6 }
  0x2e   : > { %s3599_s4 = smov [#allocation17]   ;;  %s3767_s30 = sadd.s32 1, %s3586_s28  }
  0x2f   : > { %s44_s18 = ssub.s32 %s3586_s28, %s3767_s30  ;;  %s47_s19 = sadd.s32 1, %s3582_s27 }
  0x30   : > { %s399_s17 = sshll.u32 %s5078_s5, 4  ;;  %p45_p7 = scmp.eq.s32.totalorder %s44_s18, 0  ;;  %s400_s17 = int_to_ptr.hbm [resolvable:$true] %s399_s17 }
  0x31   : > { %s426_s24 = sshll.u32 %s5079_s7, 4  ;;  %p54_p8 = scmp.ne.s32.totalorder %s3582_s27, %s3578_s26  ;;  %s427_s24 = int_to_ptr.hbm [resolvable:$true] %s426_s24 }
  0x32   : > { %2971 = dma.hbm_to_vmem [thread:$0]  (!%p3715_p6), %s400_s17, 256, %s402_s20, [#allocation9], %s3590_s3, %s3590_s3, %s3591_s12  }
  0x33   : > { %s452_s21 = sshll.u32 %s5080_s9, 4  ;;  %s466_s17 = sshll.u32 %s5081_s11, 4  ;;  %s453_s21 = int_to_ptr.hbm [resolvable:$true] %s452_s21  ;;  %s467_s17 = int_to_ptr.hbm [resolvable:$true] %s466_s17 }
  0x34   : > { %2977 = dma.hbm_to_vmem [thread:$0]  (!%p3715_p6), %s427_s24, 16, %s429_s6, [#allocation12]  }
  0x35   : > { %s3598_s20 = smov [#allocation16]   ;;  %s468_s24 = sshll.u32 %s3599_s4, 4  ;;  %s469_s24 = int_to_ptr.vmem [resolvable:$true] %s468_s24 }
  0x36   : > { %s454_s23 = sshll.u32 %s3598_s20, 4  ;;  %s2792_s6 = sadd.s32 4294967294, %s3586_s28   ;;  %s455_s23 = int_to_ptr.vmem [resolvable:$true] %s454_s23 }
  0x37   : > { %2983 = dma.hbm_to_vmem [thread:$0]  (!%p3715_p6), %s453_s21, 32, %s455_s23, [#allocation15]  }
  0x38   : > { %2986 = dma.hbm_to_vmem [thread:$0]  (!%p3715_p6), %s467_s17, 256, %s469_s24, [#allocation18], %s3590_s3, %s3590_s3, %s3591_s12  }
  0x39   : > { %p55_p9 = scmp.eq.s32.totalorder %s3586_s28, 0  ;;  %p60_p10 = scmp.ne.s32.totalorder %s3578_s26, %s3574_s25 }
  0x3a   : > { %s3778_s21 = scalar_select %p45_p7, %s3582_s27, %s47_s19  }
  0x3b   : > { %p3780_p11 = por %p55_p9, %p54_p8  ;;  %p3786_p12 = por %p61_p1, %p60_p10 }
  0x3c   : > { %5082 = sst [smem:[#allocation32_spill]] %s3778_s21  ;;  %p320_p13 = scmp.eq.s32.totalorder %s3698_s15, 1 }
  0x3d   : > { %p326_p0 = scmp.eq.s32.totalorder %s2792_s6, 1  ;;  %p3009_p2 = scmp.lt.s32.totalorder %s3586_s28, 2 }
  0x3e   : > { %s3793_s12 = sand.u32 1, %s3582_s27   ;;  %p3795_p4 = por %p320_p13, %p54_p8 }
  0x3f   : > { %p3799_p6 = por %p326_p0, %p60_p10  ;;  %s2803_s20 = sshll.u32 %s3793_s12, 8 }
  0x40   : > { %s2904_s23 = sshll.u32 %s3586_s28, 8  ;;  %s486_s18 = scalar_lea.vmem [#allocation2], %s2803_s20 }
  0x41   : > { %s492_s6 = scalar_lea.hbm %s5035_s0, %s2904_s23  ;;  %s495_s19 = sshll.u32 %s486_s18, 4  ;;  %s496_s19 = int_to_ptr.vmem [resolvable:$true] %s495_s19 }
  0x42   : > { %s493_s13 = sshll.u32 %s492_s6, 4  ;;  %p3810_p7 = pnand %p3009_p2, %p3780_p11  ;;  %s494_s13 = int_to_ptr.hbm [resolvable:$true] %s493_s13 }
  0x43   : > { %s505_s5 = sand.u32 1, %s3586_s28   ;;  %s2807_s7 = sshll.u32 %s3793_s12, 3 }
  0x44   : > { %s483_s8 = scalar_lea.sflag [#allocation3], %s3793_s12  ;;  %s3404_s9 = sshra.s32 %s494_s13, 4  ;;  %s3405_s9 = int_to_ptr.hbm [resolvable:$true] %s3404_s9 }
  0x45   : > { %s3406_s11 = scalar_lea.hbm %s3405_s9, 256  ;;  %p3408_p9 = pneg %p3810_p7 }
  0x46   : > { %p3407_p8 = scmp.ne.s32.totalorder %s3405_s9, %s3406_s11  ;;  %s3411_s23 = scalar_lea.hbm %s5035_s0, 512 }
  0x47   : > { %p3412_p11 = scmp.lt.s32.totalorder %s3405_s9, %s5035_s0  ;;  %p3413_p0 = scmp.lt.s32.totalorder %s3411_s23, %s3406_s11 }
  0x48   : > { %p3409_p10 = pnand %p3408_p9, %p3407_p8 }
  0x49   : > { %p3414_p2 = por %p3413_p0, %p3412_p11 }
  0x4a   : > { %p3410_p13 = pneg %p3409_p10 }
  0x4c   : > { %p3415_p5 = pnand %p3414_p2, %p3410_p13 }
  0x4e   : > { %3418 = shalt.err (!%p3415_p5)
}
  0x4f   : > { %s5088_s12 = smov 8   ;;  %s5089_s6 = smov 128  }
  0x50   : > { %2990 = dma.hbm_to_vmem [thread:$0]  (!%p3810_p7), %s494_s13, 4096, %s496_s19, %s483_s8, %s5089_s6, %s5089_s6, %s5088_s12  }
  0x51   : > { %s2808_s18 = sshll.u32 %s3586_s28, 3  ;;  %s509_s27 = scalar_lea.vmem [#allocation5], %s2807_s7 }
  0x52   : > { %s513_s20 = scalar_lea.hbm %s5036_s1, %s2808_s18  ;;  %s517_s4 = sshll.u32 %s509_s27, 4  ;;  %s518_s4 = int_to_ptr.vmem [resolvable:$true] %s517_s4 }
  0x53   : > { %s515_s9 = sshll.u32 %s513_s20, 4  ;;  %s506_s11 = scalar_lea.sflag [#allocation6], %s505_s5  ;;  %s516_s9 = int_to_ptr.hbm [resolvable:$true] %s515_s9 }
  0x54   : > { %s3434_s23 = sshra.s32 %s516_s9, 4  ;;  %s3441_s19 = scalar_lea.hbm %s5036_s1, 16  ;;  %s3435_s23 = int_to_ptr.hbm [resolvable:$true] %s3434_s23 }
  0x55   : > { %s3436_s24 = scalar_lea.hbm %s3435_s23, 8  ;;  %p3442_p13 = scmp.lt.s32.totalorder %s3435_s23, %s5036_s1 }
  0x56   : > { %p3437_p5 = scmp.ne.s32.totalorder %s3435_s23, %s3436_s24  ;;  %p3443_p11 = scmp.lt.s32.totalorder %s3441_s19, %s3436_s24 }
  0x58   : > { %p3439_p8 = pnand %p3437_p5, %p3408_p9  ;;  %p3444_p0 = por %p3443_p11, %p3442_p13 }
  0x5a   : > { %p3440_p10 = pneg %p3439_p8 }
  0x5c   : > { %p3445_p2 = pnand %p3444_p0, %p3440_p10 }
  0x5e   : > { %3448 = shalt.err (!%p3445_p2)
}
  0x5f   : > { %2993 = dma.hbm_to_vmem [thread:$0]  (!%p3810_p7), %s516_s9, 128, %s518_s4, %s506_s11  }
  0x60   : > { %526 = sbr.rel (%p3703_p3) target bundleno = 2373 (0x945), region = 68 }
  0x65   : > { %s3851_s5 = sand.u32 1, %s3578_s26  }
  0x66   : > { %s2810_s7 = sshll.u32 %s3851_s5, 8  ;;  %s529_s27 = scalar_lea.sflag [#allocation3], %s3851_s5 }
  0x67   : > { %s3855_s6 = scalar_lea.vmem [#allocation2], %s2810_s7 }
  0x68   : > { %3537 = dma.done.wait (%p3786_p12), %s529_s27, 4096  }
  0x69   : > { %3539 = vsyncadd (%p3786_p12), %s529_s27, 4294963200  ;;  %s538_s16 = sand.u32 1, %s3698_s15   ;;  %s3863_s14 = sshll.u32 %s3851_s5, 3 }
  0x6a   : > { %s539_s18 = scalar_lea.sflag [#allocation6], %s538_s16  ;;  %s542_s22 = scalar_lea.vmem [#allocation5], %s3863_s14 }
  0x6b   : > { %3541 = dma.done.wait (%p3786_p12), %s539_s18, 128  }
  0x6c   : > { %3543 = vsyncadd (%p3786_p12), %s539_s18, 4294967168 }
  0x6d   : > { %3545 = dma.done.wait (%p61_p1), [#allocation6], 256  }
  0x6e   : > { %3547 = vsyncadd (%p61_p1), [#allocation6], 4294967040 }
  0x6f   : > { %3549 = dma.done.wait (%p61_p1), [#allocation9], 272  }
  0x70   : > { %3551 = vsyncadd (%p61_p1), [#allocation9], 4294967024 }
  0x71   : > { %3553 = dma.done.wait (%p61_p1), [#allocation12], 32  }
  0x72   : > { %3555 = vsyncadd (%p61_p1), [#allocation12], 4294967264 }
  0x73   : > { %3557 = dma.done.wait (%p61_p1), [#allocation15], 544  }
  0x74   : > { %3559 = vsyncadd (%p61_p1), [#allocation15], 4294966752 }
  0x75   : > { %3561 = dma.done.wait (%p61_p1), [#allocation18], 256  }
  0x76   : > { %3563 = vsyncadd (%p61_p1), [#allocation18], 4294967040  ;;  %vm704_vm0 = vcmask 261120   ;;  %v2906_v0 = vld [vmem:[#allocation7 + $0x8] sm:$0xff]  ;;  %v2905_v1 = vld [vmem:[#allocation7] sm:$0xff]  ;;  %vm849_vm1 = vcmask 1041409  }
  0x77   : > { %v3891_v2 = vld [vmem:[%s3855_s6] sm:$0xff]  ;;  %v3894_v3 = vld [vmem:[%s3855_s6 + $0x8] sm:$0xff]  ;;  %v3897_v4 = vld [vmem:[%s3855_s6 + $0x10] sm:$0xff]  ;;  %885 = vmatpush.bf16.msra.mxu0 %v2906_v0  ;;  %vm851_vm2 = vcmask 1042434   ;;  %vm853_vm3 = vcmask 1043459   ;;  %vm855_vm4 = vcmask 1044484  }
  0x78   : > { %v3900_v5 = vld [vmem:[%s3855_s6 + $0x18] sm:$0xff]  ;;  %v705_v6 = vsel %vm704_vm0, %v3891_v2, 0.0  ;;  %v3905_v7 = vld [vmem:[%s3855_s6 + $0x20] sm:$0xff]  ;;  %v3908_v8 = vld [vmem:[%s3855_s6 + $0x28] sm:$0xff]  ;;  %v706_v10 = vsel %vm704_vm0, %v3894_v3, 0.0  ;;  %v708_v11 = vsel %vm704_vm0, %v3897_v4, 0.0 }
  0x79   : > { %v3911_v9 = vld [vmem:[%s3855_s6 + $0x30] sm:$0xff]  ;;  %v710_v12 = vsel %vm704_vm0, %v3900_v5, 0.0  ;;  %v3920_v13 = vld [vmem:[%s3855_s6 + $0x38] sm:$0xff]  ;;  %v3923_v14 = vld [vmem:[%s3855_s6 + $0x40] sm:$0xff]  ;;  %v707_v16 = vadd.f32 %v706_v10, %v705_v6  ;;  %v718_v17 = vsel %vm704_vm0, %v3905_v7, 0.0  ;;  %v719_v18 = vsel %vm704_vm0, %v3908_v8, 0.0 }
  0x7a   : > { %v3926_v15 = vld [vmem:[%s3855_s6 + $0x48] sm:$0xff]  ;;  %v721_v19 = vsel %vm704_vm0, %v3911_v9, 0.0  ;;  %v3935_v20 = vld [vmem:[%s3855_s6 + $0x50] sm:$0xff]  ;;  %v3938_v21 = vld [vmem:[%s3855_s6 + $0x58] sm:$0xff]  ;;  %v720_v23 = vadd.f32 %v719_v18, %v718_v17  ;;  %v723_v24 = vsel %vm704_vm0, %v3920_v13, 0.0  ;;  %v731_v25 = vsel %vm704_vm0, %v3923_v14, 0.0 }
  0x7b   : > { %v3941_v22 = vld [vmem:[%s3855_s6 + $0x60] sm:$0xff]  ;;  %v732_v26 = vsel %vm704_vm0, %v3926_v15, 0.0  ;;  %v3950_v27 = vld [vmem:[%s3855_s6 + $0x68] sm:$0xff]  ;;  %v3953_v28 = vld [vmem:[%s3855_s6 + $0x70] sm:$0xff]  ;;  %v709_v30 = vadd.f32 %v708_v11, %v707_v16  ;;  %v734_v32 = vsel %vm704_vm0, %v3935_v20, 0.0  ;;  %v736_v33 = vsel %vm704_vm0, %v3938_v21, 0.0  ;;  %886 = vmatpush.bf16.msra.mxu0 %v2905_v1 }
  0x7c   : > { %v3956_v29 = vld [vmem:[%s3855_s6 + $0x78] sm:$0xff]  ;;  %v733_v31 = vadd.f32 %v732_v26, %v731_v25  ;;  %v3963_v34 = vld [vmem:[%s3855_s6 + $0x80] sm:$0xff]  ;;  %v3966_v35 = vld [vmem:[%s3855_s6 + $0x88] sm:$0xff]  ;;  %v722_v37 = vadd.f32 %v721_v19, %v720_v23  ;;  %v744_v38 = vsel %vm704_vm0, %v3941_v22, 0.0  ;;  %v745_v39 = vsel %vm704_vm0, %v3950_v27, 0.0  ;;  %s3601_s4 = smov 64  }
  0x7d   : > { %v3969_v36 = vld [vmem:[%s3855_s6 + $0x90] sm:$0xff]  ;;  %v747_v40 = vsel %vm704_vm0, %v3953_v28, 0.0  ;;  %v3978_v41 = vld [vmem:[%s3855_s6 + $0x98] sm:$0xff]  ;;  %v3981_v42 = vld [vmem:[%s3855_s6 + $0xa0] sm:$0xff]  ;;  %v711_v43 = vadd.f32 %v710_v12, %v709_v30  ;;  %v746_v45 = vadd.f32 %v745_v39, %v744_v38  ;;  %v749_v46 = vsel %vm704_vm0, %v3956_v29, 0.0  ;;  %s3602_s9 = smov 32  }
  0x7e   : > { %v735_v44 = vadd.f32 %v734_v32, %v733_v31  ;;  %v724_v47 = vadd.f32 %v723_v24, %v722_v37  ;;  %v757_v48 = vsel %vm704_vm0, %v3963_v34, 0.0  ;;  %v758_v49 = vsel %vm704_vm0, %v3966_v35, 0.0  ;;  %v3992_v51 = vld [vmem:[%s3855_s6 + $0xa8] sm:$0xff]  ;;  %v3995_v52 = vld [vmem:[%s3855_s6 + $0xb0] sm:$0xff]  ;;  %v3998_v53 = vld [vmem:[%s3855_s6 + $0xb8] sm:$0xff]  ;;  %s3603_s24 = smov 96  }
  0x7f   : > { %v760_v50 = vsel %vm704_vm0, %v3969_v36, 0.0  ;;  %v712_v54 = vrot.slane %v711_v43, 4  ;;  %v748_v56 = vadd.f32 %v747_v40, %v746_v45  ;;  %v759_v57 = vadd.f32 %v758_v49, %v757_v48  ;;  %v4001_v58 = vld [vmem:[%s3855_s6 + $0xc0] sm:$0xff]  ;;  %v4008_v62 = vld [vmem:[%s3855_s6 + $0xc8] sm:$0xff]  ;;  %v4017_v17 = vld [vmem:[%s3855_s6 + $0xd0] sm:$0xff]  ;;  %s2899_s8 = sshll.u32 %s3698_s15, 3 }
  0x80   : > { %v737_v55 = vadd.f32 %v736_v33, %v735_v44  ;;  %v725_v59 = vrot.slane %v724_v47, 4  ;;  %v762_v60 = vsel %vm704_vm0, %v3978_v41, 0.0  ;;  %v770_v61 = vsel %vm704_vm0, %v3981_v42, 0.0  ;;  %v4024_v32 = vld [vmem:[%s3855_s6 + $0xd8] sm:$0xff]  ;;  %s5104_s21 = sld [smem:[#allocation49_spill]]  ;;  %s635_s7 = scalar_lea.vmem [#allocation20], %s3863_s14 }
  0x81   : > { %v713_v63 = vadd.f32 %v712_v54, %v711_v43  ;;  %v750_v1 = vadd.f32 %v749_v46, %v748_v56  ;;  %v761_v6 = vadd.f32 %v760_v50, %v759_v57  ;;  %v771_v11 = vsel %vm704_vm0, %v3992_v51, 0.0  ;;  %v4029_v46 = vld [vmem:[%s3855_s6 + $0xe0] sm:$0xff]  ;;  %v2908_v54 = vld [vmem:[#allocation10 + $0x8] sm:$0xff]  ;;  %s2587_s27 = sshll.u32 %s635_s7, 4  ;;  %s2561_s16 = scalar_lea.sflag [#allocation21], %s3851_s5  ;;  %s2588_s27 = int_to_ptr.vmem [resolvable:$true] %s2587_s27 }
  0x82   : > { %v738_v0 = vrot.slane %v737_v55, 4  ;;  %v726_v10 = vadd.f32 %v725_v59, %v724_v47  ;;  %v773_v12 = vsel %vm704_vm0, %v3995_v52, 0.0  ;;  %v775_v16 = vsel %vm704_vm0, %v3998_v53, 0.0  ;;  %2916 = vmatpush.bf16.msra.mxu1 %v2908_v54  ;;  %2917 = vmatpush.bf16.msra.mxu2 %v2908_v54 }
  0x83   : > { %v714_v18 = vrot.slane %v713_v63, 2  ;;  %v751_v23 = vrot.slane %v750_v1, 4  ;;  %v763_v24 = vadd.f32 %v762_v60, %v761_v6  ;;  %v772_v26 = vadd.f32 %v771_v11, %v770_v61  ;;  %v4037_v61 = vld [vmem:[%s3855_s6 + $0xf0] sm:$0xff]  ;;  %v4040_v11 = vld [vmem:[%s3855_s6 + $0xf8] sm:$0xff]  ;;  %2918 = vmatpush.bf16.msra.mxu3 %v2908_v54  ;;  %1046 = vmatpush.bf16.msrb.mxu0 %v2908_v54 }
  0x84   : > { %v739_v19 = vadd.f32 %v738_v0, %v737_v55  ;;  %v727_v25 = vrot.slane %v726_v10, 2  ;;  %v783_v30 = vsel %vm704_vm0, %v4001_v58, 0.0  ;;  %v784_v31 = vsel %vm704_vm0, %v4008_v62, 0.0  ;;  %v4032_v55 = vld [vmem:[%s3855_s6 + $0xe8] sm:$0xff] }
  0x85   : > { %v715_v33 = vadd.f32 %v714_v18, %v713_v63  ;;  %v752_v38 = vadd.f32 %v751_v23, %v750_v1  ;;  %v764_v39 = vrot.slane %v763_v24, 4  ;;  %v774_v43 = vadd.f32 %v773_v12, %v772_v26 }
  0x86   : > { %v740_v37 = vrot.slane %v739_v19, 2  ;;  %v728_v40 = vadd.f32 %v727_v25, %v726_v10  ;;  %v785_v44 = vadd.f32 %v784_v31, %v783_v30  ;;  %v786_v45 = vsel %vm704_vm0, %v4017_v17, 0.0  ;;  %v2907_v10 = vld [vmem:[#allocation10] sm:$0xff]  ;;  %s2585_s12 = scalar_lea.hbm %s5104_s21, %s2899_s8  ;;  %s3484_s20 = scalar_lea.hbm %s5104_s21, 16 }
  0x87   : > { %v716_v47 = vrot.slane %v715_v33, 1  ;;  %v753_v49 = vrot.slane %v752_v38, 2  ;;  %v765_v50 = vadd.f32 %v764_v39, %v763_v24  ;;  %v776_v57 = vadd.f32 %v775_v16, %v774_v43  ;;  %2919 = vmatpush.bf16.msra.mxu1 %v2907_v10  ;;  %2920 = vmatpush.bf16.msra.mxu2 %v2907_v10 }
  0x88   : > { %v741_v48 = vadd.f32 %v740_v37, %v739_v19  ;;  %v729_v56 = vrot.slane %v728_v40, 1  ;;  %v787_v59 = vadd.f32 %v786_v45, %v785_v44  ;;  %v788_v60 = vsel %vm704_vm0, %v4024_v32, 0.0  ;;  %2921 = vmatpush.bf16.msra.mxu3 %v2907_v10  ;;  %1047 = vmatpush.bf16.msrb.mxu0 %v2907_v10 }
  0x89   : > { %v717_v63 = vadd.f32 %v716_v47, %v715_v33  ;;  %v754_v1 = vadd.f32 %v753_v49, %v752_v38  ;;  %v766_v6 = vrot.slane %v765_v50, 2  ;;  %v777_v18 = vrot.slane %v776_v57, 4 }
  0x8a   : > { %v742_v0 = vrot.slane %v741_v48, 1  ;;  %v730_v12 = vadd.f32 %v729_v56, %v728_v40  ;;  %v789_v19 = vadd.f32 %v788_v60, %v787_v59  ;;  %v796_v16 = vsel %vm704_vm0, %v4029_v46, 0.0 }
  0x8b   : > { %v755_v24 = vrot.slane %v754_v1, 1  ;;  %v767_v25 = vadd.f32 %v766_v6, %v765_v50  ;;  %v797_v26 = vsel %vm704_vm0, %v4032_v55, 0.0  ;;  %v778_v30 = vadd.f32 %v777_v18, %v776_v57 }
  0x8c   : > { %v743_v23 = vadd.f32 %v742_v0, %v741_v48  ;;  %v790_v31 = vrot.slane %v789_v19, 4  ;;  %v798_v33 = vadd.f32 %v797_v26, %v796_v16  ;;  %v799_v37 = vsel %vm704_vm0, %v4037_v61, 0.0 }
  0x8d   : > { %v756_v38 = vadd.f32 %v755_v24, %v754_v1  ;;  %v768_v39 = vrot.slane %v767_v25, 1  ;;  %v801_v40 = vsel %vm704_vm0, %v4040_v11, 0.0  ;;  %v809_v43 = vmul.f32 0.04, %v717_v63 }
  0x8e   : > { %v779_v44 = vrot.slane %v778_v30, 2  ;;  %v791_v45 = vadd.f32 %v790_v31, %v789_v19  ;;  %v800_v47 = vadd.f32 %v799_v37, %v798_v33  ;;  %v810_v48 = vmul.f32 0.04, %v730_v12 }
  0x8f   : > { %v769_v49 = vadd.f32 %v768_v39, %v767_v25  ;;  %v811_v50 = vmul.f32 0.04, %v743_v23  ;;  %v812_v54 = vmul.f32 0.04, %v756_v38  ;;  %v817_v56 = vpack.c.bf16 %v809_v43, %v809_v43 }
  0x90   : > { %v780_v57 = vadd.f32 %v779_v44, %v778_v30  ;;  %v792_v59 = vrot.slane %v791_v45, 2  ;;  %v802_v60 = vadd.f32 %v801_v40, %v800_v47  ;;  %v818_v0 = vpack.c.bf16 %v810_v48, %v810_v48 }
  0x91   : > { %v813_v1 = vmul.f32 0.04, %v769_v49  ;;  %v819_v6 = vpack.c.bf16 %v811_v50, %v811_v50  ;;  %v820_v18 = vpack.c.bf16 %v812_v54, %v812_v54  ;;  %v841_v63 = vunpack.c.l.b16 %v817_v56 }
  0x92   : > { %v781_v16 = vrot.slane %v780_v57, 1  ;;  %v793_v24 = vadd.f32 %v792_v59, %v791_v45  ;;  %v803_v26 = vrot.slane %v802_v60, 4  ;;  %v842_v19 = vunpack.c.l.b16 %v818_v0 }
  0x93   : > { %v821_v31 = vpack.c.bf16 %v813_v1, %v813_v1  ;;  %v843_v12 = vunpack.c.l.b16 %v819_v6  ;;  %v844_v33 = vunpack.c.l.b16 %v820_v18  ;;  %v672_v49 = vpack.c.bf16 %v3897_v4, %v3897_v4 }
  0x94   : > { %v782_v10 = vadd.f32 %v781_v16, %v780_v57  ;;  %v794_v23 = vrot.slane %v793_v24, 1  ;;  %v804_v25 = vadd.f32 %v803_v26, %v802_v60  ;;  %v850_v30 = vsel %vm849_vm1, %v842_v19, %v841_v63  ;;  %v2865_v63 = vld [vmem:[#allocation14 + $0x10] sm:$0xf]  ;;  %v2912_v16 = vld [vmem:[#allocation14 + $0x14] sm:$0xf0] }
  0x95   : > { %v852_v40 = vsel %vm851_vm2, %v843_v12, %v850_v30  ;;  %v845_v43 = vunpack.c.l.b16 %v821_v31  ;;  %v673_v50 = vpack.c.bf16 %v3900_v5, %v3900_v5  ;;  %v686_v59 = vpack.c.bf16 %v3963_v34, %v3963_v34 }
  0x96   : > { %v795_v37 = vadd.f32 %v794_v23, %v793_v24  ;;  %v805_v38 = vrot.slane %v804_v25, 2  ;;  %v814_v39 = vmul.f32 0.04, %v782_v10  ;;  %v854_v48 = vsel %vm853_vm3, %v844_v33, %v852_v40 }
  0x97   : > { %v856_v60 = vsel %vm855_vm4, %v845_v43, %v854_v48  ;;  %vm857_vm5 = vcmask 1045509   ;;  %v934_v0 = vunpack.c.l.b16 %v672_v49  ;;  %v935_v1 = vunpack.c.l.b16 %v673_v50 }
  0x98   : > { %v806_v44 = vadd.f32 %v805_v38, %v804_v25  ;;  %v815_v45 = vmul.f32 0.04, %v795_v37  ;;  %v822_v47 = vpack.c.bf16 %v814_v39, %v814_v39  ;;  %vm859_vm6 = vcmask 1046534  }
  0x99   : > { %v687_v18 = vpack.c.bf16 %v3966_v35, %v3966_v35  ;;  %v965_v26 = vpack.c.b16 %v935_v1, %v934_v0  ;;  %v948_v19 = vunpack.c.l.b16 %v686_v59  ;;  %v694_v31 = vpack.c.bf16 %v4001_v58, %v4001_v58 }
  0x9a   : > { %v807_v54 = vrot.slane %v806_v44, 1  ;;  %v823_v56 = vpack.c.bf16 %v815_v45, %v815_v45  ;;  %v846_v57 = vunpack.c.l.b16 %v822_v47  ;;  %v695_v23 = vpack.c.bf16 %v4008_v62, %v4008_v62 }
  0x9b   : > { %v949_v10 = vunpack.c.l.b16 %v687_v18  ;;  %2840 = vmatmul.msk.bf16.vlgmr.msra.gmra.mxu1 %vm704_vm0, %v965_v26  ;;  %v956_v25 = vunpack.c.l.b16 %v694_v31  ;;  %v2866_v30 = vor.u32 %v2912_v16, %v2865_v63  ;;  %vm861_vm7 = vcmask 1047559   ;;  %v2910_v63 = vld [vmem:[#allocation14 + $0x4] sm:$0xf0] }
  0x9c   : > { %v808_v6 = vadd.f32 %v807_v54, %v806_v44  ;;  %v847_v24 = vunpack.c.l.b16 %v823_v56  ;;  %v858_v33 = vsel %vm857_vm5, %v846_v57, %v856_v60  ;;  %v957_v39 = vunpack.c.l.b16 %v695_v23 }
  0x9d   : > { %v972_v38 = vpack.c.b16 %v949_v10, %v948_v19  ;;  %1169 = vmatpush.bf16.msrb.mxu2 %v2866_v30  ;;  %v674_v44 = vpack.c.bf16 %v3905_v7, %v3905_v7  ;;  %v675_v62 = vpack.c.bf16 %v3908_v8, %v3908_v8  ;;  %v688_v48 = vpack.c.bf16 %v3969_v36, %v3969_v36 }
  0x9e   : > { %v816_v12 = vmul.f32 0.04, %v808_v6  ;;  %v860_v40 = vsel %vm859_vm6, %v847_v24, %v858_v33  ;;  %v976_v58 = vpack.c.b16 %v957_v39, %v956_v25  ;;  %v689_v49 = vpack.c.bf16 %v3978_v41, %v3978_v41 }
  0x9f   : > { %2847 = vmatmul.msk.bf16.vlgmr.msra.gmra.mxu2 %vm704_vm0, %v972_v38  ;;  %v936_v50 = vunpack.c.l.b16 %v674_v44  ;;  %v937_v54 = vunpack.c.l.b16 %v675_v62  ;;  %v696_v56 = vpack.c.bf16 %v4017_v17, %v4017_v17  ;;  %v697_v57 = vpack.c.bf16 %v4024_v32, %v4024_v32  ;;  %v2857_v17 = vld [vmem:[#allocation14] sm:$0xf] }
  0xa0   : > { %v824_v37 = vpack.c.bf16 %v816_v12, %v816_v12  ;;  %2851 = vmatmul.msk.bf16.vlgmr.msra.gmra.mxu3 %vm704_vm0, %v976_v58  ;;  %v950_v59 = vunpack.c.l.b16 %v688_v48  ;;  %v951_v60 = vunpack.c.l.b16 %v689_v49  ;;  %v2858_v32 = vor.u32 %v2910_v63, %v2857_v17  ;;  %v2911_v49 = vld [vmem:[#allocation14 + $0x14] sm:$0xf]  ;;  %v2909_v63 = vld [vmem:[#allocation14 + $0x4] sm:$0xf] }
  0xa1   : > { %v966_v0 = vpack.c.b16 %v937_v54, %v936_v50  ;;  %v958_v1 = vunpack.c.l.b16 %v696_v56  ;;  %v959_v6 = vunpack.c.l.b16 %v697_v57  ;;  %v690_v24 = vpack.c.bf16 %v3981_v42, %v3981_v42  ;;  %v2867_v50 = vld [vmem:[#allocation14 + $0x18] sm:$0xf0] }
  0xa2   : > { %v848_v43 = vunpack.c.l.b16 %v824_v37  ;;  %v973_v18 = vpack.c.b16 %v951_v60, %v950_v59  ;;  %1170 = vmatpush.bf16.msrb.mxu2 %v2858_v32  ;;  %v691_v26 = vpack.c.bf16 %v3992_v51, %v3992_v51  ;;  %v698_v12 = vpack.c.bf16 %v4029_v46, %v4029_v46 }
  0xa3   : > { %v977_v16 = vpack.c.b16 %v959_v6, %v958_v1  ;;  %v699_v33 = vpack.c.bf16 %v4032_v55, %v4032_v55  ;;  %v952_v10 = vunpack.c.l.b16 %v690_v24  ;;  %v678_v46 = vpack.c.bf16 %v3923_v14, %v3923_v14 }
  0xa4   : > { %v862_v45 = vsel %vm861_vm7, %v848_v43, %v860_v40  ;;  %v960_v25 = vunpack.c.l.b16 %v698_v12  ;;  %v679_v55 = vpack.c.bf16 %v3926_v15, %v3926_v15  ;;  %v700_v40 = vpack.c.bf16 %v4037_v61, %v4037_v61 }
  0xa5   : > { %v863_v47 = vpack.c.b16 %v862_v45, %v862_v45  ;;  %v961_v30 = vunpack.c.l.b16 %v699_v33  ;;  %v940_v38 = vunpack.c.l.b16 %v678_v46  ;;  %v701_v43 = vpack.c.bf16 %v4040_v11, %v4040_v11 }
  0xa6   : > { %2115 = vmatpush.msra.mxu2 %v3920_v13  ;;  %v941_v39 = vunpack.c.l.b16 %v679_v55  ;;  %v962_v45 = vunpack.c.l.b16 %v700_v40  ;;  %v2870_v56 = vor.u32 %v2911_v49, %v2867_v50  ;;  %v680_v61 = vpack.c.bf16 %v3935_v20, %v3935_v20 }
  0xa7   : > { %2830 = vmatmul.msk.bf16.vlgmr.msra.gmra.mxu0 %vm704_vm0, %v863_v47  ;;  %v963_v47 = vunpack.c.l.b16 %v701_v43  ;;  %v681_v11 = vpack.c.bf16 %v3938_v21, %v3938_v21  ;;  %v683_v1 = vpack.c.bf16 %v3950_v27, %v3950_v27  ;;  %v670_v32 = vpack.c.bf16 %v3891_v2, %v3891_v2 }
  0xa8   : > { %2070 = vmatpush.msra.mxu0 %v3900_v5  ;;  %v676_v5 = vpack.c.bf16 %v3911_v9, %v3911_v9  ;;  %2116 = vmatpush.msra.mxu2 %v3911_v9  ;;  %v978_v9 = vpack.c.b16 %v961_v30, %v960_v25  ;;  %v968_v62 = vpack.c.b16 %v941_v39, %v940_v38  ;;  %v942_v57 = vunpack.c.l.b16 %v680_v61 }
  0xa9   : > { %v979_v54 = vpack.c.b16 %v963_v47, %v962_v45  ;;  %1182 = vmatpush.bf16.msrb.mxu3 %v2870_v56  ;;  %v943_v59 = vunpack.c.l.b16 %v681_v11  ;;  %v932_v24 = vunpack.c.l.b16 %v670_v32  ;;  %v4216_v11 = vld [vmem:[#allocation11] ss:$0 sm:$0xff]  ;;  %vm1605_vm8 = vcmask 130112  }
  0xaa   : > { %2071 = vmatpush.msra.mxu0 %v3897_v4  ;;  %v677_v4 = vpack.c.bf16 %v3920_v13, %v3920_v13  ;;  %v938_v19 = vunpack.c.l.b16 %v676_v5  ;;  %2117 = vmatpush.msra.mxu2 %v3908_v8  ;;  %v953_v13 = vunpack.c.l.b16 %v691_v26  ;;  %v693_v8 = vpack.c.bf16 %v3998_v53, %v3998_v53 }
  0xab   : > { %2841 = vmatmul.msk.bf16.gmra.mxu1 %vm704_vm0, %v966_v0  ;;  %v969_v60 = vpack.c.b16 %v943_v59, %v942_v57  ;;  %v682_v0 = vpack.c.bf16 %v3941_v22, %v3941_v22  ;;  %v671_v5 = vpack.c.bf16 %v3894_v3, %v3894_v3  ;;  %vm1609_vm9 = vcmask 195712  }
  0xac   : > { %2072 = vmatpush.msra.mxu0 %v3894_v3  ;;  %v939_v31 = vunpack.c.l.b16 %v677_v4  ;;  %2118 = vmatpush.msra.mxu2 %v3905_v7  ;;  %v974_v37 = vpack.c.b16 %v953_v13, %v952_v10  ;;  %v692_v7 = vpack.c.bf16 %v3995_v52, %v3995_v52  ;;  %v955_v44 = vunpack.c.l.b16 %v693_v8  ;;  %v3074_v3 = vld [vmem:[#allocation8] ss:$0 sm:$0xff] }
  0xad   : > { %v944_v6 = vunpack.c.l.b16 %v682_v0  ;;  %v933_v26 = vunpack.c.l.b16 %v671_v5  ;;  %vm1613_vm10 = vcmask 261312   ;;  %vm2482_vm11 = vcmask 130048  }
  0xae   : > { %2073 = vmatpush.msra.mxu0 %v3891_v2  ;;  %v967_v23 = vpack.c.b16 %v939_v31, %v938_v19  ;;  %v954_v58 = vunpack.c.l.b16 %v692_v7  ;;  %v684_v19 = vpack.c.bf16 %v3953_v28, %v3953_v28  ;;  %v685_v31 = vpack.c.bf16 %v3956_v29, %v3956_v29 }
  0xaf   : > { %2848 = vmatmul.msk.bf16.gmra.mxu2 %vm704_vm0, %v973_v18  ;;  %v945_v18 = vunpack.c.l.b16 %v683_v1  ;;  %v964_v12 = vpack.c.b16 %v933_v26, %v932_v24  ;;  %v4231_v26 = vld [vmem:[#allocation13] ss:$0 sm:$0xff] }
  0xb0   : > { %2852 = vmatmul.msk.bf16.gmra.mxu3 %vm704_vm0, %v977_v16  ;;  %v975_v48 = vpack.c.b16 %v955_v44, %v954_v58  ;;  %v2859_v16 = vld [vmem:[#allocation14 + $0x8] sm:$0xf0]  ;;  %v946_v33 = vunpack.c.l.b16 %v684_v19  ;;  %v947_v10 = vunpack.c.l.b16 %v685_v31 }
  0xb1   : > { %v970_v17 = vpack.c.b16 %v945_v18, %v944_v6  ;;  %v2862_v4 = vor.u32 %v2909_v63, %v2859_v16 }
  0xb2   : > { %v971_v2 = vpack.c.b16 %v947_v10, %v946_v33 }
  0xb3   : > { %1183 = vmatpush.bf16.msrb.mxu3 %v2862_v4 }
  0xb7   : > { %2160 = vmatpush.msra.mxu3 %v3938_v21  ;;  %2839 = vmatmul.msk.bf16.vlgmr.msrb.gmra.mxu0 %vm704_vm0, %v964_v12 }
  0xb8   : > { %2205 = vmatpush.msrb.mxu0 %v3956_v29 }
  0xb9   : > { %2161 = vmatpush.msra.mxu3 %v3935_v20 }
  0xba   : > { %2206 = vmatpush.msrb.mxu0 %v3953_v28 }
  0xbb   : > { %2842 = vmatmul.msk.bf16.gmra.mxu1 %vm704_vm0, %v967_v23  ;;  %2162 = vmatpush.msra.mxu3 %v3926_v15  ;;  %v1412_v23 = vlaneseq  ;;  %v3076_v15 = vld [vmem:[%s5037_s2] ss:$0 sm:$0xff] }
  0xbc   : > { %2207 = vmatpush.msrb.mxu0 %v3950_v27 }
  0xbd   : > { %2163 = vmatpush.msra.mxu3 %v3923_v14  ;;  %v1413_v29 = vshrl.u32 %v1412_v23, 7 }
  0xbe   : > { %2208 = vmatpush.msrb.mxu0 %v3941_v22 }
  0xbf   : > { %2849 = vmatmul.msk.bf16.gmra.mxu2 %vm704_vm0, %v974_v37  ;;  %3067 = vset.pattern.permute.xlu2 %v1413_v29  ;;  %v1426_v22 = vadd.s32 16, %v1413_v29  ;;  %v1420_v27 = vadd.s32 8, %v1413_v29  ;;  %v1432_v28 = vadd.s32 24, %v1413_v29 }
  0xc0   : > { %2853 = vmatmul.msk.bf16.gmra.mxu3 %vm704_vm0, %v978_v9 }
  0xc1   : > { %3069 = vset.pattern.permute.xlu1 %v1426_v22  ;;  %3068 = vset.pattern.permute.xlu0 %v1420_v27 }
  0xc7   : > { %1416 = vperm.xlu2 %3067, %v3076_v15  }
  0xc9   : > { %1428 = vperm.xlu1 %3069, %v3076_v15   ;;  %1422 = vperm.xlu0 %3068, %v3076_v15  }
  0xcb   : > { %2843 = vmatmul.msk.bf16.gmra.mxu1 %vm704_vm0, %v968_v62 }
  0xcf   : > { %2850 = vmatmul.msk.bf16.gmra.mxu2 %vm704_vm0, %v975_v48  ;;  %3070 = vset.pattern.permute.xlu2 %v1432_v28 }
  0xd0   : > { %2854 = vmatmul.msk.bf16.gmra.mxu3 %vm704_vm0, %v979_v54  ;;  %v1134_v54 = vld [vmem:[#allocation16] sm:$0x3] }
  0xd1   : > { %v1136_v56 = vperm.slane %v1134_v54, 0  ;;  %v1137_v61 = vperm.slane %v1134_v54, 1 }
  0xd7   : > { %1434 = vperm.xlu2 %3070, %v3076_v15  }
  0xdb   : > { %2844 = vmatmul.msk.bf16.gmra.mxu1 %vm704_vm0, %v969_v60 }
  0xeb   : > { %2845 = vmatmul.msk.bf16.gmra.mxu1 %vm704_vm0, %v970_v17 }
  0xfb   : > { %2846 = vmatmul.msk.bf16.gmra.mxu1 %vm704_vm0, %v971_v2 }
 0x124   : > { %v888_v21 = vpop.f32.mrf.mxu0 }
 0x125   : > { %v4154_v13 = vadd.f32 %v3074_v3, %v888_v21 }
 0x127   : > { %5090 = vst [vmem:[#allocation33_spill] sm:$0xff] %v4154_v13  ;;  %v1129_v20 = vpack.c.bf16 %v4154_v13, %v4154_v13 }
 0x129   : > { %2871 = vmatmul.msk.bf16.vlgmr.msrb.gmra.mxu2 %vm704_vm0, %v1129_v20  ;;  %2872 = vmatmul.msk.bf16.vlgmr.msrb.gmra.mxu3 %vm704_vm0, %v1129_v20 }
 0x12a   : > { %2250 = vmatpush.msrb.mxu2 %v3978_v41  ;;  %2295 = vmatpush.msrb.mxu3 %v3998_v53 }
 0x12c   : > { %v890_v14 = vpop.f32.mrf.mxu0  ;;  %2251 = vmatpush.msrb.mxu2 %v3969_v36  ;;  %2296 = vmatpush.msrb.mxu3 %v3995_v52  ;;  %v1054_v36 = vpop.f32.mrf.mxu1 }
 0x12d   : > { %v1055_v17 = vadd.f32 %v4216_v11, %v1054_v36 }
 0x12e   : > { %2252 = vmatpush.msrb.mxu2 %v3966_v35  ;;  %2297 = vmatpush.msrb.mxu3 %v3992_v51  ;;  %v4172_v35 = vpop.f32.mrf.mxu3 }
 0x130   : > { %2253 = vmatpush.msrb.mxu2 %v3963_v34  ;;  %2298 = vmatpush.msrb.mxu3 %v3981_v42  ;;  %v4176_v34 = vpop.f32.mrf.mxu2 }
 0x134   : > { %v1056_v41 = vpop.f32.mrf.mxu1  ;;  %v1049_v49 = vpop.f32.mrf.mxu0 }
 0x135   : > { %v1050_v18 = vadd.f32 %v4216_v11, %v1049_v49  ;;  %v1057_v63 = vadd.f32 %v4216_v11, %v1056_v41 }
 0x136   : > { %v4178_v42 = vpop.f32.mrf.mxu3 }
 0x138   : > { %v4180_v25 = vpop.f32.mrf.mxu2 }
 0x13c   : > { %v1059_v52 = vpop.f32.mrf.mxu1  ;;  %v1051_v6 = vpop.f32.mrf.mxu0 }
 0x13d   : > { %v1052_v5 = vadd.f32 %v4216_v11, %v1051_v6  ;;  %v1060_v4 = vadd.f32 %v4216_v11, %v1059_v52 }
 0x13e   : > { %v4182_v30 = vpop.f32.mrf.mxu3 }
 0x140   : > { %v4186_v9 = vpop.f32.mrf.mxu2 }
 0x144   : > { %v4174_v51 = vpop.f32.mrf.mxu1 }
 0x146   : > { %v4188_v46 = vpop.f32.mrf.mxu3 }
 0x148   : > { %v4192_v7 = vpop.f32.mrf.mxu2 }
 0x14c   : > { %v1064_v53 = vpop.f32.mrf.mxu1 }
 0x14d   : > { %v1065_v31 = vadd.f32 %v4216_v11, %v1064_v53 }
 0x14e   : > { %v4194_v8 = vpop.f32.mrf.mxu3 }
 0x150   : > { %v4198_v39 = vpop.f32.mrf.mxu2 }
 0x154   : > { %v4184_v37 = vpop.f32.mrf.mxu1 }
 0x156   : > { %v4200_v40 = vpop.f32.mrf.mxu3 }
 0x158   : > { %v4204_v58 = vpop.f32.mrf.mxu2 }
 0x15c   : > { %v4190_v55 = vpop.f32.mrf.mxu1 }
 0x15e   : > { %v4206_v44 = vpop.f32.mrf.mxu3 }
 0x160   : > { %v4210_v45 = vpop.f32.mrf.mxu2 }
 0x164   : > { %v4196_v38 = vpop.f32.mrf.mxu1 }
 0x166   : > { %v4212_v47 = vpop.f32.mrf.mxu3 }
 0x168   : > { %v4214_v50 = vpop.f32.mrf.mxu2 }
 0x16c   : > { %v4202_v43 = vpop.f32.mrf.mxu1 }
 0x174   : > { %v4208_v62 = vpop.f32.mrf.mxu1 }
 0x17c   : > { %v1079_v48 = vpop.f32.mrf.mxu1 }
 0x17d   : > { %v1080_v41 = vadd.f32 %v4216_v11, %v1079_v48  ;;  %v1062_v48 = vadd.f32 %v4216_v11, %v4174_v51  ;;  %v1090_v51 = vadd.f32 %v4216_v11, %v4176_v34  ;;  %v1110_v34 = vadd.f32 %v4216_v11, %v4172_v35 }
 0x17e   : > { %v1097_v35 = vadd.f32 %v4216_v11, %v4192_v7 }
 0x184   : > { %v4218_v60 = vpop.f32.mrf.mxu1 }
 0x18c   : > { %v4246_v49 = vpop.f32.mrf.mxu1 }
 0x1ac   : > { %v1172_v57 = vpop.f32.mrf.mxu2  ;;  %v1185_v59 = vpop.f32.mrf.mxu3 }
 0x1ad   : > { %v4220_v0 = vadd.f32 %v1172_v57, %v1136_v56  ;;  %v4222_v1 = vadd.f32 %v1185_v59, %v1137_v61 }
 0x1af   : > { %5091 = vst [vmem:[#allocation34_spill] sm:$0xff] %v4220_v0  ;;  %v1197_v16 = vperm.slane %v4220_v0, 0  ;;  %v1190_v32 = vrot.slane %v4220_v0, 1  ;;  %v1192_v12 = vrot.slane %v4220_v0, 3  ;;  %v1191_v21 = vrot.slane %v4220_v0, 2 }
 0x1b0   : > { %5092 = vst [vmem:[#allocation35_spill] sm:$0xff] %v4222_v1 }
 0x1b1   : > { %v1216_v24 = vadd.f32 %v1197_v16, %v1057_v63  ;;  %v1215_v19 = vadd.f32 %v1197_v16, %v1055_v17  ;;  %v1213_v33 = vadd.f32 %v1197_v16, %v1050_v18  ;;  %v4235_v10 = vperm.slane %v1190_v32, 0 }
 0x1b2   : > { %v1214_v20 = vadd.f32 %v1197_v16, %v1052_v5  ;;  %v4243_v52 = vperm.slane %v1192_v12, 0  ;;  %v4251_v18 = vperm.slane %v1191_v21, 0  ;;  %v1193_v17 = vrot.slane %v4220_v0, 4 }
 0x1b3   : > { %v1248_v2 = vmax.f32 %v1216_v24, 0.0  ;;  %v1247_v3 = vmax.f32 %v1215_v19, 0.0  ;;  %v1245_v15 = vmax.f32 %v1213_v33, 0.0  ;;  %v1219_v22 = vadd.f32 %v4235_v10, %v1065_v31 }
 0x1b4   : > { %v1174_v29 = vpop.f32.mrf.mxu2  ;;  %v1187_v14 = vpop.f32.mrf.mxu3  ;;  %v1217_v27 = vadd.f32 %v4235_v10, %v1060_v4  ;;  %v1246_v59 = vmax.f32 %v1214_v20, 0.0  ;;  %v1070_v63 = vadd.f32 %v4216_v11, %v4190_v55  ;;  %v1225_v5 = vadd.f32 %v4243_v52, %v1080_v41 }
 0x1b5   : > { %v1284_v28 = vmul.f32 %v4231_v26, %v1248_v2  ;;  %v1283_v36 = vmul.f32 %v4231_v26, %v1247_v3  ;;  %v1281_v53 = vmul.f32 %v4231_v26, %v1245_v15  ;;  %v1251_v61 = vmax.f32 %v1219_v22, 0.0  ;;  %v1086_v14 = vpop.f32.mrf.mxu1 }
 0x1b6   : > { %v1249_v57 = vmax.f32 %v1217_v27, 0.0  ;;  %v1218_v4 = vadd.f32 %v4235_v10, %v1062_v48  ;;  %v1282_v24 = vmul.f32 %v4231_v26, %v1246_v59  ;;  %v1221_v19 = vadd.f32 %v4251_v18, %v1070_v63 }
 0x1b7   : > { %v1322_v54 = vsel %vm704_vm0, %v1284_v28, 0.0  ;;  %v1319_v56 = vsel %vm704_vm0, %v1283_v36, 0.0  ;;  %v1313_v6 = vsel %vm704_vm0, %v1281_v53, 0.0  ;;  %v1287_v16 = vmul.f32 %v4231_v26, %v1251_v61 }
 0x1b8   : > { %1323 = vadd.xlane.f32.xlu1 %v1322_v54  ;;  %1320 = vadd.xlane.f32.xlu2 %v1319_v56  ;;  %v1285_v32 = vmul.f32 %v4231_v26, %v1249_v57  ;;  %v4264_v31 = vperm.slane %v1193_v17, 0  ;;  %v1072_v55 = vadd.f32 %v4216_v11, %v4196_v38  ;;  %v1077_v12 = vadd.f32 %v4216_v11, %v4208_v62 }
 0x1b9   : > { %1314 = vadd.xlane.f32.xlu0 %v1313_v6  ;;  %v1331_v33 = vsel %vm704_vm0, %v1287_v16, 0.0  ;;  %v1257_v3 = vmax.f32 %v1225_v5, 0.0  ;;  %v1250_v21 = vmax.f32 %v1218_v4, 0.0  ;;  %v1316_v20 = vsel %vm704_vm0, %v1282_v24, 0.0 }
 0x1ba   : > { %v1325_v2 = vsel %vm704_vm0, %v1285_v32, 0.0  ;;  %v1253_v29 = vmax.f32 %v1221_v19, 0.0  ;;  %v1229_v38 = vadd.f32 %v4264_v31, %v1090_v51  ;;  %v1222_v62 = vadd.f32 %v4251_v18, %v1072_v55 }
 0x1bb   : > { %v1196_v15 = vrot.slane %v4220_v0, 7  ;;  %v1092_v22 = vadd.f32 %v4216_v11, %v4180_v25  ;;  %v1112_v27 = vadd.f32 %v4216_v11, %v4178_v42  ;;  %v1115_v28 = vadd.f32 %v4216_v11, %v4182_v30 }
 0x1bc   : > { %v1224_v36 = vadd.f32 %v4251_v18, %v1077_v12  ;;  %v1117_v41 = vadd.f32 %v4216_v11, %v4188_v46  ;;  %v1293_v53 = vmul.f32 %v4231_v26, %v1257_v3  ;;  %v1286_v54 = vmul.f32 %v4231_v26, %v1250_v21 }
 0x1bd   : > { %v1067_v25 = vadd.f32 %v4216_v11, %v4184_v37  ;;  %v1122_v42 = vadd.f32 %v4216_v11, %v4200_v40  ;;  %v1087_v30 = vadd.f32 %v4216_v11, %v1086_v14  ;;  %v1289_v56 = vmul.f32 %v4231_v26, %v1253_v29 }
 0x1be   : > { %v1261_v61 = vmax.f32 %v1229_v38, 0.0  ;;  %v1254_v57 = vmax.f32 %v1222_v62, 0.0  ;;  %v4299_v7 = vperm.slane %v1196_v15, 0  ;;  %v1195_v46 = vrot.slane %v4220_v0, 6 }
 0x1bf   : > { %v1120_v59 = vadd.f32 %v4216_v11, %v4194_v8  ;;  %v1125_v6 = vadd.f32 %v4216_v11, %v4206_v44  ;;  %v1256_v37 = vmax.f32 %v1224_v36, 0.0  ;;  %v1230_v48 = vadd.f32 %v4264_v31, %v1092_v22 }
 0x1c0   : > { %1332 = vadd.xlane.f32.xlu2 %v1331_v33  ;;  %1326 = vadd.xlane.f32.xlu1 %v1325_v2  ;;  %v1075_v40 = vadd.f32 %v4216_v11, %v4202_v43  ;;  %v1349_v17 = vsel %vm704_vm0, %v1293_v53, 0.0  ;;  %v1328_v63 = vsel %vm704_vm0, %v1286_v54, 0.0  ;;  %v1220_v16 = vadd.f32 %v4235_v10, %v1067_v25 }
 0x1c1   : > { %1317 = vadd.xlane.f32.xlu0 %v1316_v20  ;;  %v1228_v32 = vadd.f32 %v4243_v52, %v1087_v30  ;;  %v1337_v8 = vsel %vm704_vm0, %v1289_v56, 0.0  ;;  %v1194_v44 = vrot.slane %v4220_v0, 5  ;;  %v1232_v5 = vadd.f32 %v4264_v31, %v1097_v35 }
 0x1c2   : > { %v1297_v4 = vmul.f32 %v4231_v26, %v1261_v61  ;;  %v1290_v43 = vmul.f32 %v4231_v26, %v1254_v57  ;;  %v1203_v24 = vperm.slane %v1195_v46, 0  ;;  %v1242_v19 = vadd.f32 %v4299_v7, %v1122_v42 }
 0x1c3   : > { %v1292_v10 = vmul.f32 %v4231_v26, %v1256_v37  ;;  %v1262_v51 = vmax.f32 %v1230_v48, 0.0  ;;  %v1264_v55 = vmax.f32 %v1232_v5, 0.0  ;;  %v1241_v12 = vadd.f32 %v4299_v7, %v1120_v59 }
 0x1c4   : > { %v1252_v33 = vmax.f32 %v1220_v16, 0.0  ;;  %v1238_v2 = vadd.f32 %v1203_v24, %v1112_v27  ;;  %v1237_v3 = vadd.f32 %v1203_v24, %v1110_v34  ;;  %v1239_v21 = vadd.f32 %v1203_v24, %v1115_v28 }
 0x1c5   : > { %v4322_v20 = vmul.f32 %v4231_v26, %v1264_v55  ;;  %v1274_v29 = vmax.f32 %v1242_v19, 0.0  ;;  %v1273_v14 = vmax.f32 %v1241_v12, 0.0  ;;  %v1243_v38 = vadd.f32 %v4299_v7, %v1125_v6 }
 0x1c6   : > { %v1361_v62 = vsel %vm704_vm0, %v1297_v4, 0.0  ;;  %v1270_v15 = vmax.f32 %v1238_v2, 0.0  ;;  %v1269_v22 = vmax.f32 %v1237_v3, 0.0  ;;  %v1271_v36 = vmax.f32 %v1239_v21, 0.0 }
 0x1c7   : > { %v1340_v35 = vsel %vm704_vm0, %v1290_v43, 0.0  ;;  %v4328_v53 = vmul.f32 %v4231_v26, %v1274_v29  ;;  %v4331_v34 = vmul.f32 %v4231_v26, %v1273_v14  ;;  %v1275_v27 = vmax.f32 %v1243_v38, 0.0 }
 0x1c8   : > { %1350 = vadd.xlane.f32.xlu2 %v1349_v17  ;;  %1329 = vadd.xlane.f32.xlu1 %v1328_v63  ;;  %v4333_v28 = vperm.slane %v1194_v44, 0  ;;  %v4336_v54 = vmul.f32 %v4231_v26, %v1270_v15  ;;  %v4339_v25 = vmul.f32 %v4231_v26, %v1269_v22  ;;  %v4342_v42 = vmul.f32 %v4231_v26, %v1271_v36 }
 0x1c9   : > { %1338 = vadd.xlane.f32.xlu0 %v1337_v8  ;;  %v1260_v30 = vmax.f32 %v1228_v32, 0.0  ;;  %v1346_v56 = vsel %vm704_vm0, %v1292_v10, 0.0  ;;  %v4346_v61 = vmul.f32 %v4231_v26, %v1275_v27  ;;  %v1240_v57 = vadd.f32 %v1203_v24, %v1117_v41 }
 0x1ca   : > { %v1100_v46 = vadd.f32 %v4216_v11, %v4198_v39  ;;  %v1095_v59 = vadd.f32 %v4216_v11, %v4186_v9  ;;  %v1298_v37 = vmul.f32 %v4231_v26, %v1262_v51  ;;  %v1288_v48 = vmul.f32 %v4231_v26, %v1252_v33 }
 0x1cb   : > { %v1272_v6 = vmax.f32 %v1240_v57, 0.0  ;;  %v1223_v63 = vadd.f32 %v4251_v18, %v1075_v40  ;;  %v1296_v16 = vmul.f32 %v4231_v26, %v1260_v30  ;;  %v1082_v39 = vadd.f32 %v4216_v11, %v4218_v60 }
 0x1cc   : > { %v1233_v17 = vadd.f32 %v4333_v28, %v1100_v46  ;;  %v1231_v41 = vadd.f32 %v4264_v31, %v1095_v59  ;;  %v1127_v9 = vadd.f32 %v4216_v11, %v4212_v47  ;;  %v1364_v8 = vsel %vm704_vm0, %v1298_v37, 0.0 }
 0x1cd   : > { %v4359_v32 = vmul.f32 %v4231_v26, %v1272_v6  ;;  %v1334_v44 = vsel %vm704_vm0, %v1288_v48, 0.0  ;;  %v1255_v4 = vmax.f32 %v1223_v63, 0.0  ;;  %v1358_v18 = vsel %vm704_vm0, %v1296_v16, 0.0  ;;  %v4422_v63 = vpop.permute.xlu0 %1422 }
 0x1ce   : > { %v1265_v5 = vmax.f32 %v1233_v17, 0.0  ;;  %v1263_v31 = vmax.f32 %v1231_v41, 0.0  ;;  %v1102_v40 = vadd.f32 %v4216_v11, %v4204_v58  ;;  %v1244_v47 = vadd.f32 %v4299_v7, %v1127_v9 }
 0x1cf   : > { %v1291_v43 = vmul.f32 %v4231_v26, %v1255_v4  ;;  %v1226_v24 = vadd.f32 %v4243_v52, %v1082_v39  ;;  %v1085_v51 = vadd.f32 %v4216_v11, %v4246_v49  ;;  %v1105_v3 = vadd.f32 %v4216_v11, %v4210_v45 }
 0x1d0   : > { %1362 = vadd.xlane.f32.xlu2 %v1361_v62  ;;  %1341 = vadd.xlane.f32.xlu1 %v1340_v35  ;;  %v1301_v60 = vmul.f32 %v4231_v26, %v1265_v5  ;;  %v1299_v19 = vmul.f32 %v4231_v26, %v1263_v31  ;;  %v1234_v10 = vadd.f32 %v4333_v28, %v1102_v40  ;;  %v1276_v58 = vmax.f32 %v1244_v47, 0.0 }
 0x1d1   : > { %1347 = vadd.xlane.f32.xlu0 %v1346_v56  ;;  %v1343_v12 = vsel %vm704_vm0, %v1291_v43, 0.0  ;;  %v1258_v33 = vmax.f32 %v1226_v24, 0.0  ;;  %v1227_v49 = vadd.f32 %v4243_v52, %v1085_v51  ;;  %v1235_v38 = vadd.f32 %v4333_v28, %v1105_v3 }
 0x1d2   : > { %v1373_v55 = vsel %vm704_vm0, %v1301_v60, 0.0  ;;  %v1367_v2 = vsel %vm704_vm0, %v1299_v19, 0.0  ;;  %v1266_v7 = vmax.f32 %v1234_v10, 0.0  ;;  %v1312_v21 = vmul.f32 %v4231_v26, %v1276_v58 }
 0x1d3   : > { %v1294_v29 = vmul.f32 %v4231_v26, %v1258_v33  ;;  %v1259_v22 = vmax.f32 %v1227_v49, 0.0  ;;  %v1267_v45 = vmax.f32 %v1235_v38, 0.0  ;;  %v1370_v56 = vsel %vm704_vm0, %v4322_v20, 0.0 }
 0x1d4   : > { %v1302_v14 = vmul.f32 %v4231_v26, %v1266_v7  ;;  %v1406_v62 = vsel %vm704_vm0, %v1312_v21, 0.0  ;;  %v1388_v57 = vsel %vm704_vm0, %v4336_v54, 0.0  ;;  %v1107_v46 = vadd.f32 %v4216_v11, %v4214_v50 }
 0x1d5   : > { %v1352_v15 = vsel %vm704_vm0, %v1294_v29, 0.0  ;;  %v1295_v35 = vmul.f32 %v4231_v26, %v1259_v22  ;;  %v1303_v27 = vmul.f32 %v4231_v26, %v1267_v45  ;;  %v1385_v6 = vsel %vm704_vm0, %v4339_v25, 0.0  ;;  %v4416_v25 = vpop.permute.xlu2 %1416 }
 0x1d6   : > { %v1376_v36 = vsel %vm704_vm0, %v1302_v14, 0.0  ;;  %v1236_v59 = vadd.f32 %v4333_v28, %v1107_v46  ;;  %v1391_v48 = vsel %vm704_vm0, %v4342_v42, 0.0  ;;  %v1400_v50 = vsel %vm704_vm0, %v4328_v53, 0.0  ;;  %v4420_v42 = vpop.permute.xlu1 %1428 }
 0x1d7   : > { %v1355_v52 = vsel %vm704_vm0, %v1295_v35, 0.0  ;;  %v1379_v30 = vsel %vm704_vm0, %v1303_v27, 0.0  ;;  %v3600_v11 = vmov 0   ;;  %v1397_v28 = vsel %vm704_vm0, %v4331_v34, 0.0 }
 0x1d8   : > { %1365 = vadd.xlane.f32.xlu2 %v1364_v8  ;;  %1335 = vadd.xlane.f32.xlu1 %v1334_v44  ;;  %v1268_v37 = vmax.f32 %v1236_v59, 0.0  ;;  %v1403_v54 = vsel %vm704_vm0, %v4346_v61, 0.0 }
 0x1d9   : > { %1359 = vadd.xlane.f32.xlu0 %v1358_v18  ;;  %3073 = vset.pattern.permute.xlu2 %v3600_v11 }
 0x1da   : > { %v1304_v20 = vmul.f32 %v4231_v26, %v1268_v37  ;;  %3071 = vset.pattern.permute.xlu1 %v3600_v11  ;;  %3072 = vset.pattern.permute.xlu0 %v3600_v11  ;;  %v1394_v26 = vsel %vm704_vm0, %v4359_v32, 0.0 }
 0x1dc   : > { %v1382_v17 = vsel %vm704_vm0, %v1304_v20, 0.0 }
 0x1dd   : > { %v4418_v53 = vpop.permute.xlu2 %1434 }
 0x1e0   : > { %1374 = vadd.xlane.f32.xlu2 %v1373_v55  ;;  %1344 = vadd.xlane.f32.xlu1 %v1343_v12 }
 0x1e1   : > { %1368 = vadd.xlane.f32.xlu0 %v1367_v2 }
 0x1e8   : > { %1407 = vadd.xlane.f32.xlu2 %v1406_v62  ;;  %1353 = vadd.xlane.f32.xlu1 %v1352_v15 }
 0x1e9   : > { %1377 = vadd.xlane.f32.xlu0 %v1376_v36 }
 0x1f0   : > { %1356 = vadd.xlane.f32.xlu1 %v1355_v52 }
 0x1f1   : > { %1380 = vadd.xlane.f32.xlu0 %v1379_v30 }
 0x1f8   : > { %1371 = vadd.xlane.f32.xlu1 %v1370_v56 }
 0x1f9   : > { %1389 = vadd.xlane.f32.xlu0 %v1388_v57 }
 0x200   : > { %1386 = vadd.xlane.f32.xlu1 %v1385_v6 }
 0x201   : > { %1392 = vadd.xlane.f32.xlu0 %v1391_v48 }
 0x208   : > { %1383 = vadd.xlane.f32.xlu1 %v1382_v17 }
 0x209   : > { %1401 = vadd.xlane.f32.xlu0 %v1400_v50 }
 0x210   : > { %1398 = vadd.xlane.f32.xlu1 %v1397_v28 }
 0x211   : > { %1404 = vadd.xlane.f32.xlu0 %v1403_v54 }
 0x218   : > { %1395 = vadd.xlane.f32.xlu1 %v1394_v26 }
 0x22b   : > { %v1324_v16 = vpop.xlane.xlu1 %1323  ;;  %v1321_v34 = vpop.xlane.xlu2 %1320 }
 0x22c   : > { %v4425_v41 = vadd.f32 %v4420_v42, %v1321_v34  ;;  %v1315_v39 = vpop.xlane.xlu0 %1314  ;;  %v4444_v40 = vadd.f32 %v4418_v53, %v1324_v16 }
 0x22d   : > { %v4429_v61 = vadd.f32 %v4416_v25, %v1315_v39 }
 0x22e   : > { %1511 = vperm.xlu2 %3073, %v4425_v41  }
 0x231   : > { %1505 = vperm.xlu1 %3071, %v4429_v61  }
 0x233   : > { %v1327_v32 = vpop.xlane.xlu1 %1326  ;;  %v1333_v5 = vpop.xlane.xlu2 %1332 }
 0x234   : > { %v4433_v9 = vadd.f32 %v4416_v25, %v1327_v32  ;;  %v1318_v8 = vpop.xlane.xlu0 %1317  ;;  %v4453_v24 = vadd.f32 %v4420_v42, %v1333_v5 }
 0x235   : > { %v4436_v44 = vadd.f32 %v4422_v63, %v1318_v8 }
 0x236   : > { %1517 = vperm.xlu2 %3073, %v4433_v9  }
 0x237   : > { %1508 = vperm.xlu0 %3072, %v4436_v44  }
 0x23b   : > { %v1330_v4 = vpop.xlane.xlu1 %1329  ;;  %v1351_v43 = vpop.xlane.xlu2 %1350 }
 0x23c   : > { %v4441_v18 = vadd.f32 %v4422_v63, %v1330_v4  ;;  %v1339_v31 = vpop.xlane.xlu0 %1338  ;;  %v4456_v10 = vadd.f32 %v4416_v25, %v1351_v43 }
 0x23d   : > { %v4447_v60 = vadd.f32 %v4416_v25, %v1339_v31  ;;  %v4553_v31 = vand.u32 127, %v1412_v23 }
 0x23e   : > { %1520 = vperm.xlu1 %3071, %v4441_v18  }
 0x23f   : > { %1514 = vperm.xlu0 %3072, %v4444_v40   ;;  %1529 = vperm.xlu2 %3073, %v4447_v60  }
 0x243   : > { %v1342_v47 = vpop.xlane.xlu1 %1341  ;;  %v1363_v3 = vpop.xlane.xlu2 %1362 }
 0x244   : > { %v1348_v19 = vpop.xlane.xlu0 %1347  ;;  %v4461_v55 = vadd.f32 %v4422_v63, %v1342_v47  ;;  %v4481_v15 = vadd.f32 %v4416_v25, %v1363_v3  ;;  %v4559_v47 = vadd.s32 4294967280, %v4553_v31 }
 0x245   : > { %v4473_v29 = vadd.f32 %v4418_v53, %v1348_v19 }
 0x246   : > { %1523 = vperm.xlu1 %3071, %v4453_v24  }
 0x247   : > { %1541 = vperm.xlu0 %3072, %v4456_v10  }
 0x24b   : > { %v1336_v51 = vpop.xlane.xlu1 %1335  ;;  %v1366_v38 = vpop.xlane.xlu2 %1365 }
 0x24c   : > { %v4464_v12 = vadd.f32 %v4418_v53, %v1336_v51  ;;  %v1360_v58 = vpop.xlane.xlu0 %1359  ;;  %v4487_v45 = vadd.f32 %v4422_v63, %v1366_v38 }
 0x24d   : > { %v4493_v52 = vadd.f32 %v4418_v53, %v1360_v58 }
 0x24e   : > { %1532 = vperm.xlu1 %3071, %v4461_v55   ;;  %1526 = vperm.xlu2 %3073, %v4464_v12  }
 0x253   : > { %v1345_v33 = vpop.xlane.xlu1 %1344  ;;  %v1375_v35 = vpop.xlane.xlu2 %1374 }
 0x254   : > { %v4469_v2 = vadd.f32 %v4420_v42, %v1345_v33  ;;  %v1369_v7 = vpop.xlane.xlu0 %1368  ;;  %v4499_v57 = vadd.f32 %v4416_v25, %v1375_v35  ;;  %v4570_v35 = vadd.s32 4294967272, %v4553_v31 }
 0x255   : > { %v4496_v30 = vadd.f32 %v4420_v42, %v1369_v7 }
 0x256   : > { %1535 = vperm.xlu1 %3071, %v4469_v2  }
 0x25b   : > { %v1354_v21 = vpop.xlane.xlu1 %1353  ;;  %v1408_v32 = vpop.xlane.xlu2 %1407 }
 0x25c   : > { %v4476_v49 = vadd.f32 %v4422_v63, %v1354_v21  ;;  %v1378_v14 = vpop.xlane.xlu0 %1377 }
 0x25d   : > { %v4505_v59 = vadd.f32 %v4422_v63, %v1378_v14 }
 0x25e   : > { %1544 = vperm.xlu2 %3073, %v4476_v49   ;;  %1538 = vperm.xlu1 %3071, %v4473_v29  }
 0x263   : > { %v1357_v62 = vpop.xlane.xlu1 %1356 }
 0x264   : > { %v4484_v22 = vadd.f32 %v4420_v42, %v1357_v62  ;;  %v1381_v36 = vpop.xlane.xlu0 %1380 }
 0x265   : > { %v4511_v37 = vadd.f32 %v4420_v42, %v1381_v36 }
 0x266   : > { %1547 = vperm.xlu0 %3072, %v4484_v22   ;;  %1553 = vperm.xlu2 %3073, %v4481_v15  }
 0x267   : > { %1556 = vperm.xlu1 %3071, %v4487_v45  }
 0x26b   : > { %v1372_v27 = vpop.xlane.xlu1 %1371 }
 0x26c   : > { %v1390_v56 = vpop.xlane.xlu0 %1389  ;;  %v4508_v6 = vadd.f32 %v4418_v53, %v1372_v27 }
 0x26d   : > { %v4517_v17 = vadd.f32 %v4422_v63, %v1390_v56 }
 0x26e   : > { %1550 = vperm.xlu0 %3072, %v4493_v52   ;;  %1559 = vperm.xlu2 %3073, %v4496_v30  }
 0x26f   : > { %1565 = vperm.xlu1 %3071, %v4499_v57  }
 0x273   : > { %v1387_v46 = vpop.xlane.xlu1 %1386 }
 0x274   : > { %v1393_v48 = vpop.xlane.xlu0 %1392  ;;  %v4520_v50 = vadd.f32 %v4416_v25, %v1387_v46 }
 0x275   : > { %v4529_v26 = vadd.f32 %v4420_v42, %v1393_v48 }
 0x276   : > { %1562 = vperm.xlu2 %3073, %v4508_v6   ;;  %1568 = vperm.xlu0 %3072, %v4505_v59  }
 0x277   : > { %1571 = vperm.xlu1 %3071, %v4511_v37  }
 0x27b   : > { %v1384_v20 = vpop.xlane.xlu1 %1383 }
 0x27c   : > { %v4523_v11 = vadd.f32 %v4418_v53, %v1384_v20  ;;  %v1402_v28 = vpop.xlane.xlu0 %1401 }
 0x27d   : > { %v4535_v34 = vadd.f32 %v4422_v63, %v1402_v28 }
 0x27e   : > { %1577 = vperm.xlu0 %3072, %v4520_v50   ;;  %1580 = vperm.xlu2 %3073, %v4517_v17  }
 0x27f   : > { %1574 = vperm.xlu1 %3071, %v4523_v11   ;;  %5094 = vst [vmem:[#allocation37_spill] sm:$0xff] %v4535_v34 }
 0x283   : > { %v1399_v54 = vpop.xlane.xlu1 %1398 }
 0x284   : > { %v4532_v16 = vadd.f32 %v4416_v25, %v1399_v54  ;;  %v1405_v39 = vpop.xlane.xlu0 %1404  ;;  %v4547_v25 = vadd.f32 %v4418_v53, %v1408_v32 }
 0x285   : > { %v4541_v5 = vadd.f32 %v4420_v42, %v1405_v39  ;;  %v4556_v42 = vadd.s32 4294967288, %v4553_v31 }
 0x286   : > { %5093 = vst [vmem:[#allocation36_spill] sm:$0xff] %v4532_v16  ;;  %1589 = vperm.xlu2 %3073, %v4532_v16   ;;  %1583 = vperm.xlu0 %3072, %v4529_v26  }
 0x287   : > { %1592 = vperm.xlu1 %3071, %v4535_v34   ;;  %5095 = vst [vmem:[#allocation38_spill] sm:$0xff] %v4541_v5 }
 0x288   : > { %5096 = vst [vmem:[#allocation39_spill] sm:$0xff] %v4547_v25  ;;  %v1512_v63 = vpop.permute.xlu2 %1511 }
 0x289   : > { %v1608_v33 = vperm.slane %v1512_v63, %v4559_v47 }
 0x28b   : > { %v1396_v8 = vpop.xlane.xlu1 %1395 }
 0x28c   : > { %v4544_v4 = vadd.f32 %v4418_v53, %v1396_v8 }
 0x28e   : > { %1586 = vperm.xlu0 %3072, %v4544_v4   ;;  %1595 = vperm.xlu2 %3073, %v4541_v5  }
 0x28f   : > { %1598 = vperm.xlu1 %3071, %v4547_v25  }
 0x290   : > { %v1518_v43 = vpop.permute.xlu2 %1517 }
 0x291   : > { %v1615_v14 = vperm.slane %v1518_v43, %v4553_v31 }
 0x299   : > { %v1530_v3 = vpop.permute.xlu2 %1529 }
 0x2a3   : > { %v1506_v19 = vpop.permute.xlu1 %1505 }
 0x2a4   : > { %v1602_v51 = vperm.slane %v1506_v19, %v4553_v31 }
 0x2a8   : > { %v1527_v27 = vpop.permute.xlu2 %1526 }
 0x2a9   : > { %v1509_v53 = vpop.permute.xlu0 %1508  ;;  %v1620_v20 = vperm.slane %v1527_v27, %v4570_v35 }
 0x2aa   : > { %v1604_v58 = vperm.slane %v1509_v53, %v4556_v42 }
 0x2ac   : > { %v1606_v23 = vsel %vm1605_vm8, %v1604_v58, %v1602_v51 }
 0x2ad   : > { %v1610_v7 = vsel %vm1609_vm9, %v1608_v33, %v1606_v23 }
 0x2b0   : > { %v1521_v21 = vpop.permute.xlu1 %1520 }
 0x2b1   : > { %v1616_v38 = vperm.slane %v1521_v21, %v4556_v42  ;;  %v1515_v36 = vpop.permute.xlu0 %1514 }
 0x2b2   : > { %v1612_v56 = vperm.slane %v1515_v36, %v4570_v35 }
 0x2b3   : > { %v1617_v62 = vsel %vm1605_vm8, %v1616_v38, %v1615_v14 }
 0x2b4   : > { %v1614_v54 = vsel %vm1613_vm10, %v1612_v56, %v1610_v7 }
 0x2b8   : > { %v1524_v46 = vpop.permute.xlu1 %1523  ;;  %v1545_v63 = vpop.permute.xlu2 %1544 }
 0x2b9   : > { %v1618_v48 = vperm.slane %v1524_v46, %v4559_v47  ;;  %v1542_v53 = vpop.permute.xlu0 %1541 }
 0x2bb   : > { %v1619_v28 = vsel %vm1609_vm9, %v1618_v48, %v1617_v62 }
 0x2bc   : > { %v1621_v39 = vsel %vm1613_vm10, %v1620_v20, %v1619_v28  ;;  %v1630_v20 = vperm.slane %v1545_v63, %v4556_v42  ;;  %v1629_v28 = vperm.slane %v1542_v53, %v4553_v31 }
 0x2bd   : > { %v1664_v32 = vsel %vm849_vm1, %v1621_v39, %v1614_v54  ;;  %v1622_v39 = vperm.slane %v1530_v3, %v4553_v31 }
 0x2c0   : > { %v1533_v8 = vpop.permute.xlu1 %1532  ;;  %v1554_v19 = vpop.permute.xlu2 %1553 }
 0x2c1   : > { %v1623_v48 = vperm.slane %v1533_v8, %v4556_v42  ;;  %v1636_v63 = vperm.slane %v1554_v19, %v4553_v31 }
 0x2c3   : > { %v1624_v8 = vsel %vm1605_vm8, %v1623_v48, %v1622_v39 }
 0x2c8   : > { %v1536_v43 = vpop.permute.xlu1 %1535  ;;  %v1560_v58 = vpop.permute.xlu2 %1559 }
 0x2c9   : > { %v1625_v54 = vperm.slane %v1536_v43, %v4559_v47  ;;  %v1631_v43 = vsel %vm1605_vm8, %v1630_v20, %v1629_v28 }
 0x2cb   : > { %v1626_v3 = vsel %vm1609_vm9, %v1625_v54, %v1624_v8 }
 0x2d0   : > { %v1539_v51 = vpop.permute.xlu1 %1538  ;;  %v1563_v21 = vpop.permute.xlu2 %1562 }
 0x2d1   : > { %v1627_v13 = vperm.slane %v1539_v51, %v4570_v35  ;;  %v1639_v51 = vperm.slane %v1560_v58, %v4559_v47 }
 0x2d8   : > { %v1548_v33 = vpop.permute.xlu0 %1547  ;;  %v1581_v27 = vpop.permute.xlu2 %1580 }
 0x2d9   : > { %v1557_v23 = vpop.permute.xlu1 %1556  ;;  %v1632_v0 = vperm.slane %v1548_v33, %v4559_v47  ;;  %v1628_v33 = vsel %vm1613_vm10, %v1627_v13, %v1626_v3 }
 0x2da   : > { %v1637_v1 = vperm.slane %v1557_v23, %v4556_v42 }
 0x2e0   : > { %v1551_v14 = vpop.permute.xlu0 %1550  ;;  %v1590_v46 = vpop.permute.xlu2 %1589 }
 0x2e1   : > { %v1566_v38 = vpop.permute.xlu1 %1565  ;;  %v1634_v5 = vperm.slane %v1551_v14, %v4570_v35  ;;  %v1638_v14 = vsel %vm1605_vm8, %v1637_v1, %v1636_v63  ;;  %v1657_v1 = vperm.slane %v1590_v46, %v4553_v31 }
 0x2e2   : > { %v1643_v23 = vperm.slane %v1566_v38, %v4553_v31  ;;  %v1665_v38 = vsel %vm851_vm2, %v1628_v33, %v1664_v32  ;;  %v1640_v13 = vsel %vm1609_vm9, %v1639_v51, %v1638_v14 }
 0x2e8   : > { %v1569_v36 = vpop.permute.xlu0 %1568  ;;  %v1596_v54 = vpop.permute.xlu2 %1595 }
 0x2e9   : > { %v1572_v62 = vpop.permute.xlu1 %1571  ;;  %v1644_v25 = vperm.slane %v1569_v36, %v4556_v42  ;;  %v1633_v36 = vsel %vm1609_vm9, %v1632_v0, %v1631_v43  ;;  %v1660_v46 = vperm.slane %v1596_v54, %v4559_v47 }
 0x2ea   : > { %v1646_v34 = vperm.slane %v1572_v62, %v4559_v47  ;;  %v1635_v48 = vsel %vm1613_vm10, %v1634_v5, %v1633_v36  ;;  %v1641_v62 = vperm.slane %v1563_v21, %v4570_v35  ;;  %v1651_v5 = vperm.slane %v1581_v27, %v4556_v42 }
 0x2eb   : > { %v1645_v19 = vsel %vm1605_vm8, %v1644_v25, %v1643_v23  ;;  %v1666_v25 = vsel %vm853_vm3, %v1635_v48, %v1665_v38 }
 0x2ec   : > { %v1642_v8 = vsel %vm1613_vm10, %v1641_v62, %v1640_v13 }
 0x2f0   : > { %v1578_v7 = vpop.permute.xlu0 %1577 }
 0x2f1   : > { %v1575_v56 = vpop.permute.xlu1 %1574  ;;  %v1650_v58 = vperm.slane %v1578_v7, %v4553_v31 }
 0x2f2   : > { %v1648_v20 = vperm.slane %v1575_v56, %v4570_v35  ;;  %v1647_v56 = vsel %vm1609_vm9, %v1646_v34, %v1645_v19  ;;  %v1667_v34 = vsel %vm855_vm4, %v1642_v8, %v1666_v25 }
 0x2f3   : > { %v1652_v63 = vsel %vm1605_vm8, %v1651_v5, %v1650_v58 }
 0x2f4   : > { %v1649_v39 = vsel %vm1613_vm10, %v1648_v20, %v1647_v56 }
 0x2f5   : > { %v1668_v51 = vsel %vm857_vm5, %v1649_v39, %v1667_v34 }
 0x2f8   : > { %v1584_v16 = vpop.permute.xlu0 %1583 }
 0x2f9   : > { %v1593_v53 = vpop.permute.xlu1 %1592  ;;  %v1653_v0 = vperm.slane %v1584_v16, %v4559_v47 }
 0x2fa   : > { %v1658_v28 = vperm.slane %v1593_v53, %v4556_v42 }
 0x2fb   : > { %v1654_v27 = vsel %vm1609_vm9, %v1653_v0, %v1652_v63 }
 0x2fc   : > { %v1659_v7 = vsel %vm1605_vm8, %v1658_v28, %v1657_v1 }
 0x2fd   : > { %v1661_v3 = vsel %vm1609_vm9, %v1660_v46, %v1659_v7 }
 0x300   : > { %v1587_v32 = vpop.permute.xlu0 %1586 }
 0x301   : > { %v1599_v16 = vpop.permute.xlu1 %1598  ;;  %v1655_v21 = vperm.slane %v1587_v32, %v4570_v35 }
 0x302   : > { %v1662_v53 = vperm.slane %v1599_v16, %v4570_v35 }
 0x303   : > { %v1656_v43 = vsel %vm1613_vm10, %v1655_v21, %v1654_v27 }
 0x304   : > { %v1663_v23 = vsel %vm1613_vm10, %v1662_v53, %v1661_v3  ;;  %v1669_v33 = vsel %vm859_vm6, %v1656_v43, %v1668_v51 }
 0x305   : > { %v1670_v14 = vsel %vm861_vm7, %v1663_v23, %v1669_v33 }
 0x306   : > { %v1672_v36 = vsel %vm704_vm0, %v1670_v14, -inf }
 0x307   : > { %1673 = vmax.xlane.f32.xlu0 %v1672_v36 }
 0x37a   : > { %v4628_v48 = vpop.xlane.xlu0 %1673 }
 0x37b   : > { %v4631_v19 = vperm.slane %v4628_v48, 0  ;;  %v4634_v20 = vperm.slane %v4628_v48, 3  ;;  %v1677_v13 = vperm.slane %v4628_v48, 1  ;;  %v4665_v8 = vperm.slane %v4628_v48, 6 }
 0x37c   : > { %v1678_v63 = vperm.slane %v4628_v48, 2 }
 0x37d   : > { %v1704_v28 = vsub.f32 %v4456_v10, %v4634_v20  ;;  %v1693_v58 = vsub.f32 %v4436_v44, %v4631_v19  ;;  %v1692_v38 = vsub.f32 %v4429_v61, %v4631_v19  ;;  %v1707_v62 = vsub.f32 %v4493_v52, %v4634_v20 }
 0x37e   : > { %v1697_v5 = vsub.f32 %v4441_v18, %v1677_v13  ;;  %v1696_v10 = vsub.f32 %v4433_v9, %v1677_v13  ;;  %v4648_v44 = vperm.slane %v4628_v48, 5  ;;  %v1698_v18 = vsub.f32 %v4453_v24, %v1677_v13 }
 0x37f   : > { %v1748_v1 = vmul.f32 1.442695, %v1704_v28  ;;  %v1726_v54 = vmul.f32 1.442695, %v1693_v58  ;;  %v1724_v0 = vmul.f32 1.442695, %v1692_v38  ;;  %v1694_v52 = vsub.f32 %v4425_v41, %v4631_v19 }
 0x380   : > { %v1754_v25 = vmul.f32 1.442695, %v1707_v62  ;;  %v1734_v61 = vmul.f32 1.442695, %v1697_v5  ;;  %v1732_v39 = vmul.f32 1.442695, %v1696_v10  ;;  %v1713_v9 = vsub.f32 %v4505_v59, %v4648_v44 }
 0x381   : > { %3078 = vpow2.f32 %v1748_v1  ;;  %v1736_v16 = vmul.f32 1.442695, %v1698_v18  ;;  %v1728_v27 = vmul.f32 1.442695, %v1694_v52  ;;  %v1716_v41 = vsub.f32 %v4520_v50, %v4665_v8 }
 0x382   : > { %3080 = vpow2.f32 %v1726_v54  ;;  %v1766_v46 = vmul.f32 1.442695, %v1713_v9  ;;  %v1701_v24 = vsub.f32 %v4461_v55, %v1678_v63  ;;  %v1700_v34 = vsub.f32 %v4447_v60, %v1678_v63 }
 0x383   : > { %3082 = vpow2.f32 %v1724_v0  ;;  %v1772_v43 = vmul.f32 1.442695, %v1716_v41  ;;  %v1718_v55 = vsub.f32 %v4529_v26, %v4665_v8  ;;  %v1699_v60 = vsub.f32 %v4464_v12, %v1677_v13 }
 0x384   : > { %3084 = vpow2.f32 %v1754_v25  ;;  %v1742_v3 = vmul.f32 1.442695, %v1701_v24  ;;  %v1740_v23 = vmul.f32 1.442695, %v1700_v34  ;;  %v1695_v50 = vsub.f32 %v4444_v40, %v4631_v19 }
 0x385   : > { %3086 = vpow2.f32 %v1734_v61  ;;  %v1776_v36 = vmul.f32 1.442695, %v1718_v55  ;;  %v1738_v28 = vmul.f32 1.442695, %v1699_v60  ;;  %v1719_v12 = vsub.f32 %v4544_v4, %v4665_v8 }
 0x386   : > { %3088 = vpow2.f32 %v1732_v39  ;;  %v1730_v38 = vmul.f32 1.442695, %v1695_v50  ;;  %v1705_v40 = vsub.f32 %v4476_v49, %v4634_v20  ;;  %v1702_v26 = vsub.f32 %v4469_v2, %v1678_v63 }
 0x387   : > { %v4650_v56 = vpop.eup %3078  ;;  %3090 = vpow2.f32 %v1766_v46  ;;  %v1778_v19 = vmul.f32 1.442695, %v1719_v12  ;;  %v1706_v2 = vsub.f32 %v4484_v22, %v4634_v20  ;;  %v1703_v49 = vsub.f32 %v4473_v29, %v1678_v63 }
 0x388   : > { %v4652_v7 = vpop.eup %3080  ;;  %1857 = vperm.xlu0 %3072, %v4650_v56   ;;  %3092 = vpow2.f32 %v1736_v16  ;;  %v1750_v13 = vmul.f32 1.442695, %v1705_v40  ;;  %v1744_v62 = vmul.f32 1.442695, %v1702_v26  ;;  %v1680_v4 = vperm.slane %v4628_v48, 4  ;;  %v5099_v26 = vld [vmem:[#allocation39_spill] sm:$0xff] }
 0x389   : > { %v4655_v32 = vpop.eup %3082  ;;  %1824 = vperm.xlu1 %3071, %v4652_v7   ;;  %3094 = vpow2.f32 %v1728_v27  ;;  %v1752_v25 = vmul.f32 1.442695, %v1706_v2  ;;  %v1746_v39 = vmul.f32 1.442695, %v1703_v49  ;;  %v1712_v16 = vsub.f32 %v4499_v57, %v4648_v44 }
 0x38a   : > { %1821 = vperm.xlu2 %3073, %v4655_v32   ;;  %v4668_v21 = vpop.eup %3084  ;;  %3096 = vpow2.f32 %v1772_v43  ;;  %v1709_v22 = vsub.f32 %v4487_v45, %v1680_v4  ;;  %v1708_v29 = vsub.f32 %v4481_v15, %v1680_v4  ;;  %v1710_v45 = vsub.f32 %v4496_v30, %v1680_v4 }
 0x38b   : > { %v4670_v59 = vpop.eup %3086  ;;  %3098 = vpow2.f32 %v1742_v3  ;;  %v1764_v27 = vmul.f32 1.442695, %v1712_v16  ;;  %v1714_v34 = vsub.f32 %v4511_v37, %v4648_v44  ;;  %v1711_v57 = vsub.f32 %v4508_v6, %v1680_v4 }
 0x38c   : > { %v4673_v53 = vpop.eup %3088  ;;  %3100 = vpow2.f32 %v1740_v23  ;;  %v1758_v20 = vmul.f32 1.442695, %v1709_v22  ;;  %v1756_v52 = vmul.f32 1.442695, %v1708_v29  ;;  %v1760_v41 = vmul.f32 1.442695, %v1710_v45 }
 0x38d   : > { %v4681_v51 = vpop.eup %3090  ;;  %3102 = vpow2.f32 %v1776_v36  ;;  %v1768_v43 = vmul.f32 1.442695, %v1714_v34  ;;  %v1762_v3 = vmul.f32 1.442695, %v1711_v57  ;;  %v1715_v55 = vsub.f32 %v4523_v11, %v4648_v44  ;;  %v5098_v11 = vld [vmem:[#allocation36_spill] sm:$0xff] }
 0x38e   : > { %v4683_v33 = vpop.eup %3092  ;;  %3104 = vpow2.f32 %v1738_v28  ;;  %v1717_v37 = vsub.f32 %v4517_v17, %v4665_v8  ;;  %v1683_v6 = vperm.slane %v4628_v48, 7 }
 0x38f   : > { %v4686_v14 = vpop.eup %3094  ;;  %3106 = vpow2.f32 %v1730_v38  ;;  %v1770_v60 = vmul.f32 1.442695, %v1715_v55  ;;  %v5097_v38 = vld [vmem:[#allocation37_spill] sm:$0xff] }
 0x390   : > { %1866 = vperm.xlu0 %3072, %v4668_v21   ;;  %v4695_v58 = vpop.eup %3096  ;;  %3108 = vpow2.f32 %v1778_v19  ;;  %v1774_v50 = vmul.f32 1.442695, %v1717_v37  ;;  %v1721_v12 = vsub.f32 %v5097_v38, %v1683_v6  ;;  %v1720_v44 = vsub.f32 %v5098_v11, %v1683_v6 }
 0x391   : > { %1836 = vperm.xlu1 %3071, %v4670_v59   ;;  %v4697_v1 = vpop.eup %3098  ;;  %3110 = vpow2.f32 %v1750_v13  ;;  %v1723_v19 = vsub.f32 %v5099_v26, %v1683_v6  ;;  %v5100_v13 = vld [vmem:[#allocation38_spill] sm:$0xff] }
 0x392   : > { %1833 = vperm.xlu2 %3073, %v4673_v53   ;;  %v4700_v54 = vpop.eup %3100  ;;  %3112 = vpow2.f32 %v1744_v62  ;;  %v1782_v40 = vmul.f32 1.442695, %v1721_v12  ;;  %v1780_v17 = vmul.f32 1.442695, %v1720_v44  ;;  %v1722_v62 = vsub.f32 %v5100_v13, %v1683_v6 }
 0x393   : > { %v4709_v0 = vpop.eup %3102  ;;  %3114 = vpow2.f32 %v1752_v25  ;;  %v1786_v2 = vmul.f32 1.442695, %v1723_v19 }
 0x394   : > { %v4711_v5 = vpop.eup %3104  ;;  %3116 = vpow2.f32 %v1746_v39  ;;  %v1784_v49 = vmul.f32 1.442695, %v1722_v62 }
 0x395   : > { %v4714_v10 = vpop.eup %3106  ;;  %3118 = vpow2.f32 %v1758_v20 }
 0x396   : > { %v4722_v61 = vpop.eup %3108  ;;  %3120 = vpow2.f32 %v1756_v52 }
 0x397   : > { %v4724_v9 = vpop.eup %3110  ;;  %3122 = vpow2.f32 %v1764_v27 }
 0x398   : > { %1884 = vperm.xlu0 %3072, %v4681_v51   ;;  %v4727_v18 = vpop.eup %3112  ;;  %3124 = vpow2.f32 %v1760_v41 }
 0x399   : > { %1839 = vperm.xlu1 %3071, %v4683_v33   ;;  %v4733_v46 = vpop.eup %3114  ;;  %3126 = vpow2.f32 %v1768_v43 }
 0x39a   : > { %1827 = vperm.xlu2 %3073, %v4686_v14   ;;  %v4735_v63 = vpop.eup %3116  ;;  %3128 = vpow2.f32 %v1762_v3 }
 0x39b   : > { %v4742_v15 = vpop.eup %3118  ;;  %3130 = vpow2.f32 %v1770_v60 }
 0x39c   : > { %v4744_v24 = vpop.eup %3120  ;;  %3132 = vpow2.f32 %v1774_v50 }
 0x39d   : > { %v4751_v30 = vpop.eup %3122  ;;  %3134 = vpow2.f32 %v1782_v40 }
 0x39e   : > { %v4753_v23 = vpop.eup %3124  ;;  %3136 = vpow2.f32 %v1780_v17 }
 0x39f   : > { %v4762_v36 = vpop.eup %3126  ;;  %3138 = vpow2.f32 %v1786_v2 }
 0x3a0   : > { %1893 = vperm.xlu0 %3072, %v4695_v58   ;;  %v4764_v28 = vpop.eup %3128  ;;  %3140 = vpow2.f32 %v1784_v49 }
 0x3a1   : > { %1848 = vperm.xlu1 %3071, %v4697_v1   ;;  %v4770_v8 = vpop.eup %3130 }
 0x3a2   : > { %1845 = vperm.xlu2 %3073, %v4700_v54   ;;  %v4772_v48 = vpop.eup %3132 }
 0x3a3   : > { %v4778_v4 = vpop.eup %3134 }
 0x3a4   : > { %v4780_v25 = vpop.eup %3136 }
 0x3a5   : > { %v4784_v22 = vpop.eup %3138 }
 0x3a6   : > { %v4786_v29 = vpop.eup %3140 }
 0x3a8   : > { %1899 = vperm.xlu0 %3072, %v4709_v0  }
 0x3a9   : > { %1842 = vperm.xlu1 %3071, %v4711_v5  }
 0x3aa   : > { %1830 = vperm.xlu2 %3073, %v4714_v10  }
 0x3b0   : > { %1902 = vperm.xlu0 %3072, %v4722_v61  }
 0x3b1   : > { %1860 = vperm.xlu1 %3071, %v4724_v9  }
 0x3b2   : > { %1851 = vperm.xlu2 %3073, %v4727_v18  }
 0x3b9   : > { %1863 = vperm.xlu1 %3071, %v4733_v46  }
 0x3ba   : > { %1854 = vperm.xlu2 %3073, %v4735_v63  }
 0x3c1   : > { %1872 = vperm.xlu1 %3071, %v4742_v15  }
 0x3c2   : > { %1869 = vperm.xlu2 %3073, %v4744_v24  }
 0x3c9   : > { %1881 = vperm.xlu1 %3071, %v4751_v30  }
 0x3ca   : > { %1875 = vperm.xlu2 %3073, %v4753_v23  }
 0x3d1   : > { %1887 = vperm.xlu1 %3071, %v4762_v36  }
 0x3d2   : > { %1878 = vperm.xlu2 %3073, %v4764_v28  }
 0x3d9   : > { %1890 = vperm.xlu1 %3071, %v4770_v8  }
 0x3da   : > { %1896 = vperm.xlu2 %3073, %v4772_v48  }
 0x3e1   : > { %1908 = vperm.xlu1 %3071, %v4778_v4  }
 0x3e2   : > { %1905 = vperm.xlu2 %3073, %v4780_v25  }
 0x3e4   : > { %v1822_v39 = vpop.permute.xlu2 %1821 }
 0x3e5   : > { %v1916_v45 = vperm.slane %v1822_v39, %v4553_v31 }
 0x3e9   : > { %1914 = vperm.xlu1 %3071, %v4784_v22  }
 0x3ea   : > { %1911 = vperm.xlu2 %3073, %v4786_v29  }
 0x3ec   : > { %v1834_v20 = vpop.permute.xlu2 %1833 }
 0x3ed   : > { %v1923_v55 = vperm.slane %v1834_v20, %v4553_v31 }
 0x3f4   : > { %v1828_v52 = vpop.permute.xlu2 %1827 }
 0x3f5   : > { %v1919_v34 = vperm.slane %v1828_v52, %v4559_v47 }
 0x3fb   : > { %v1825_v16 = vpop.permute.xlu1 %1824 }
 0x3fc   : > { %v1917_v27 = vperm.slane %v1825_v16, %v4556_v42  ;;  %v1846_v41 = vpop.permute.xlu2 %1845 }
 0x3fd   : > { %v1930_v40 = vperm.slane %v1846_v41, %v4553_v31 }
 0x3fe   : > { %v1918_v57 = vsel %vm1605_vm8, %v1917_v27, %v1916_v45 }
 0x3ff   : > { %v1920_v43 = vsel %vm1609_vm9, %v1919_v34, %v1918_v57  ;;  %v1858_v57 = vpop.permute.xlu0 %1857 }
 0x403   : > { %v1837_v3 = vpop.permute.xlu1 %1836 }
 0x404   : > { %v1924_v37 = vperm.slane %v1837_v3, %v4556_v42  ;;  %v1831_v60 = vpop.permute.xlu2 %1830 }
 0x405   : > { %v1921_v19 = vperm.slane %v1831_v60, %v4570_v35 }
 0x406   : > { %v1925_v6 = vsel %vm1605_vm8, %v1924_v37, %v1923_v55 }
 0x407   : > { %v1922_v52 = vsel %vm1613_vm10, %v1921_v19, %v1920_v43  ;;  %v1867_v37 = vpop.permute.xlu0 %1866 }
 0x40b   : > { %v1840_v50 = vpop.permute.xlu1 %1839 }
 0x40c   : > { %v1926_v38 = vperm.slane %v1840_v50, %v4559_v47  ;;  %v1852_v11 = vpop.permute.xlu2 %1851 }
 0x40d   : > { %v1933_v13 = vperm.slane %v1852_v11, %v4559_v47 }
 0x40e   : > { %v1927_v12 = vsel %vm1609_vm9, %v1926_v38, %v1925_v6 }
 0x40f   : > { %v1885_v50 = vpop.permute.xlu0 %1884 }
 0x413   : > { %v1849_v44 = vpop.permute.xlu1 %1848 }
 0x414   : > { %v1931_v17 = vperm.slane %v1849_v44, %v4556_v42  ;;  %v1855_v62 = vpop.permute.xlu2 %1854 }
 0x415   : > { %v1935_v20 = vperm.slane %v1855_v62, %v4570_v35 }
 0x416   : > { %v1932_v26 = vsel %vm1605_vm8, %v1931_v17, %v1930_v40 }
 0x417   : > { %v1934_v49 = vsel %vm1609_vm9, %v1933_v13, %v1932_v26  ;;  %v1894_v43 = vpop.permute.xlu0 %1893 }
 0x418   : > { %v1936_v45 = vsel %vm1613_vm10, %v1935_v20, %v1934_v49  ;;  %v1937_v49 = vperm.slane %v1858_v57, %v4553_v31 }
 0x41b   : > { %v1843_v2 = vpop.permute.xlu1 %1842 }
 0x41c   : > { %v1928_v39 = vperm.slane %v1843_v2, %v4570_v35  ;;  %v1870_v3 = vpop.permute.xlu2 %1869 }
 0x41d   : > { %v1944_v62 = vperm.slane %v1870_v3, %v4553_v31  ;;  %v1942_v3 = vperm.slane %v1867_v37, %v4570_v35 }
 0x41e   : > { %v1929_v16 = vsel %vm1613_vm10, %v1928_v39, %v1927_v12 }
 0x41f   : > { %v1972_v27 = vsel %vm849_vm1, %v1929_v16, %v1922_v52  ;;  %v1900_v26 = vpop.permute.xlu0 %1899 }
 0x420   : > { %v1973_v41 = vsel %vm851_vm2, %v1936_v45, %v1972_v27 }
 0x423   : > { %v1861_v34 = vpop.permute.xlu1 %1860 }
 0x424   : > { %v1876_v6 = vpop.permute.xlu2 %1875  ;;  %v1938_v19 = vperm.slane %v1861_v34, %v4556_v42 }
 0x425   : > { %v1947_v52 = vperm.slane %v1876_v6, %v4559_v47 }
 0x426   : > { %v1939_v20 = vsel %vm1605_vm8, %v1938_v19, %v1937_v49  ;;  %v1958_v19 = vperm.slane %v1894_v43, %v4553_v31 }
 0x427   : > { %v1903_v49 = vpop.permute.xlu0 %1902 }
 0x42b   : > { %v1864_v55 = vpop.permute.xlu1 %1863 }
 0x42c   : > { %v1879_v38 = vpop.permute.xlu2 %1878  ;;  %v1940_v2 = vperm.slane %v1864_v55, %v4559_v47  ;;  %v1952_v55 = vperm.slane %v1885_v50, %v4556_v42 }
 0x42d   : > { %v1949_v6 = vperm.slane %v1879_v38, %v4570_v35 }
 0x42e   : > { %v1941_v45 = vsel %vm1609_vm9, %v1940_v2, %v1939_v20  ;;  %v1961_v2 = vperm.slane %v1900_v26, %v4559_v47 }
 0x433   : > { %v1873_v60 = vpop.permute.xlu1 %1872 }
 0x434   : > { %v1897_v40 = vpop.permute.xlu2 %1896  ;;  %v1945_v17 = vperm.slane %v1873_v60, %v4556_v42 }
 0x435   : > { %v1959_v27 = vperm.slane %v1897_v40, %v4556_v42 }
 0x436   : > { %v1946_v39 = vsel %vm1605_vm8, %v1945_v17, %v1944_v62 }
 0x437   : > { %v1948_v57 = vsel %vm1609_vm9, %v1947_v52, %v1946_v39  ;;  %v1960_v37 = vsel %vm1605_vm8, %v1959_v27, %v1958_v19 }
 0x438   : > { %v1962_v20 = vsel %vm1609_vm9, %v1961_v2, %v1960_v37 }
 0x43b   : > { %v1882_v11 = vpop.permute.xlu1 %1881 }
 0x43c   : > { %v1906_v13 = vpop.permute.xlu2 %1905  ;;  %v1951_v16 = vperm.slane %v1882_v11, %v4553_v31  ;;  %v1943_v11 = vsel %vm1613_vm10, %v1942_v3, %v1941_v45  ;;  %v1963_v45 = vperm.slane %v1903_v49, %v4570_v35 }
 0x43d   : > { %v1974_v39 = vsel %vm853_vm3, %v1943_v11, %v1973_v41 }
 0x43e   : > { %v1953_v62 = vsel %vm1605_vm8, %v1952_v55, %v1951_v16 }
 0x443   : > { %v1888_v44 = vpop.permute.xlu1 %1887 }
 0x444   : > { %v1954_v34 = vperm.slane %v1888_v44, %v4559_v47  ;;  %v1950_v44 = vsel %vm1613_vm10, %v1949_v6, %v1948_v57  ;;  %v1912_v43 = vpop.permute.xlu2 %1911 }
 0x445   : > { %v1975_v16 = vsel %vm855_vm4, %v1950_v44, %v1974_v39  ;;  %v1968_v27 = vperm.slane %v1912_v43, %v4559_v47 }
 0x446   : > { %v1955_v50 = vsel %vm1609_vm9, %v1954_v34, %v1953_v62 }
 0x44b   : > { %v1891_v12 = vpop.permute.xlu1 %1890 }
 0x44c   : > { %v1956_v17 = vperm.slane %v1891_v12, %v4570_v35  ;;  %v1965_v12 = vperm.slane %v1906_v13, %v4553_v31 }
 0x44e   : > { %v1957_v38 = vsel %vm1613_vm10, %v1956_v17, %v1955_v50 }
 0x44f   : > { %v1976_v26 = vsel %vm857_vm5, %v1957_v38, %v1975_v16 }
 0x453   : > { %v1909_v60 = vpop.permute.xlu1 %1908 }
 0x454   : > { %v1966_v40 = vperm.slane %v1909_v60, %v4556_v42  ;;  %v1964_v60 = vsel %vm1613_vm10, %v1963_v45, %v1962_v20 }
 0x455   : > { %v1977_v55 = vsel %vm859_vm6, %v1964_v60, %v1976_v26 }
 0x456   : > { %v1967_v52 = vsel %vm1605_vm8, %v1966_v40, %v1965_v12 }
 0x457   : > { %v1969_v3 = vsel %vm1609_vm9, %v1968_v27, %v1967_v52 }
 0x45b   : > { %v1915_v34 = vpop.permute.xlu1 %1914 }
 0x45c   : > { %v1970_v13 = vperm.slane %v1915_v34, %v4570_v35 }
 0x45e   : > { %v1971_v41 = vsel %vm1613_vm10, %v1970_v13, %v1969_v3 }
 0x45f   : > { %v1978_v57 = vsel %vm861_vm7, %v1971_v41, %v1977_v55  ;;  %v3156_v55 = vld [vmem:[%s3855_s6 + $0xf8] sm:$0xff] }
 0x460   : > { %v1980_v17 = vsel %vm704_vm0, %v1978_v57, 0.0  ;;  %v3157_v57 = vld [vmem:[%s3855_s6 + $0xf0] sm:$0xff] }
 0x461   : > { %1981 = vadd.xlane.f32.xlu0 %v1980_v17 }
 0x4d4   : > { %v1982_v19 = vpop.xlane.xlu0 %1981 }
 0x4d5   : > { %3142 = vrcp.f32 %v1982_v19 }
 0x4db   : > { %v3143_v6 = vpop.eup %3142 }
 0x4dc   : > { %v1987_v11 = vperm.slane %v3143_v6, 2  ;;  %v1986_v62 = vperm.slane %v3143_v6, 1  ;;  %v1988_v50 = vperm.slane %v3143_v6, 3  ;;  %v1990_v43 = vperm.slane %v3143_v6, 5 }
 0x4dd   : > { %v1985_v38 = vperm.slane %v3143_v6, 0  ;;  %v1992_v39 = vperm.slane %v3143_v6, 7  ;;  %v1989_v52 = vperm.slane %v3143_v6, 4 }
 0x4de   : > { %v2011_v40 = vmul.f32 %v4727_v18, %v1987_v11  ;;  %v2006_v44 = vmul.f32 %v4670_v59, %v1986_v62  ;;  %v2005_v37 = vmul.f32 %v4673_v53, %v1986_v62  ;;  %v2014_v2 = vmul.f32 %v4724_v9, %v1988_v50 }
 0x4df   : > { %v2008_v49 = vmul.f32 %v4711_v5, %v1986_v62  ;;  %v2007_v12 = vmul.f32 %v4683_v33, %v1986_v62  ;;  %v2022_v18 = vmul.f32 %v4681_v51, %v1990_v43  ;;  %v2002_v59 = vmul.f32 %v4652_v7, %v1985_v38 }
 0x4e0   : > { %2134 = vperm.xlu0 %3072, %v2011_v40   ;;  %2086 = vperm.xlu1 %3071, %v2006_v44   ;;  %v2001_v53 = vmul.f32 %v4655_v32, %v1985_v38  ;;  %v2024_v9 = vmul.f32 %v4770_v8, %v1990_v43  ;;  %v2009_v5 = vmul.f32 %v4700_v54, %v1987_v11  ;;  %v1991_v32 = vperm.slane %v3143_v6, 6  ;;  %v3158_v6 = vld [vmem:[%s3855_s6 + $0xe8] sm:$0xff] }
 0x4e1   : > { %2083 = vperm.xlu2 %3073, %v2005_v37   ;;  %v2003_v33 = vmul.f32 %v4686_v14, %v1985_v38  ;;  %v2031_v20 = vmul.f32 %v4786_v29, %v1992_v39  ;;  %v2004_v51 = vmul.f32 %v4714_v10, %v1985_v38  ;;  %v2010_v7 = vmul.f32 %v4697_v1, %v1987_v11 }
 0x4e2   : > { %v2026_v8 = vmul.f32 %v4772_v48, %v1991_v32  ;;  %v2017_v54 = vmul.f32 %v4744_v24, %v1989_v52  ;;  %v2012_v14 = vmul.f32 %v4735_v63, %v1987_v11  ;;  %v2019_v29 = vmul.f32 %v4753_v23, %v1989_v52  ;;  %v3159_v11 = vld [vmem:[%s3855_s6 + $0xe0] sm:$0xff] }
 0x4e3   : > { %v2018_v10 = vmul.f32 %v4742_v15, %v1989_v52  ;;  %v2013_v1 = vmul.f32 %v4650_v56, %v1988_v50  ;;  %v2020_v16 = vmul.f32 %v4764_v28, %v1989_v52  ;;  %v2021_v48 = vmul.f32 %v4751_v30, %v1990_v43 }
 0x4e4   : > { %v2015_v24 = vmul.f32 %v4733_v46, %v1988_v50  ;;  %v2023_v63 = vmul.f32 %v4762_v36, %v1990_v43  ;;  %v2016_v23 = vmul.f32 %v4668_v21, %v1988_v50  ;;  %v2030_v15 = vmul.f32 %v4778_v4, %v1992_v39  ;;  %v5101_v4 = vld [vmem:[#allocation34_spill] sm:$0xff] }
 0x4e5   : > { %v2029_v56 = vmul.f32 %v4780_v25, %v1992_v39  ;;  %v2025_v28 = vmul.f32 %v4695_v58, %v1991_v32  ;;  %v2032_v30 = vmul.f32 %v4784_v22, %v1992_v39  ;;  %v2028_v45 = vmul.f32 %v4722_v61, %v1991_v32 }
 0x4e6   : > { %v2027_v36 = vmul.f32 %v4709_v0, %v1991_v32  ;;  %v3161_v32 = vld [vmem:[%s3855_s6 + $0xd0] sm:$0xff] }
 0x4e8   : > { %2176 = vperm.xlu0 %3072, %v2014_v2   ;;  %2092 = vperm.xlu1 %3071, %v2008_v49  }
 0x4e9   : > { %2089 = vperm.xlu2 %3073, %v2007_v12  }
 0x4f0   : > { %2266 = vperm.xlu0 %3072, %v2022_v18   ;;  %2041 = vperm.xlu1 %3071, %v2002_v59  }
 0x4f1   : > { %2038 = vperm.xlu2 %3073, %v2001_v53  }
 0x4f8   : > { %2272 = vperm.xlu0 %3072, %v2024_v9   ;;  %2128 = vperm.xlu1 %3071, %v2009_v5  }
 0x4f9   : > { %2044 = vperm.xlu2 %3073, %v2003_v33  }
 0x500   : > { %2359 = vperm.xlu0 %3072, %v2031_v20   ;;  %2047 = vperm.xlu1 %3071, %v2004_v51  }
 0x501   : > { %2131 = vperm.xlu2 %3073, %v2010_v7   ;;  %v3160_v7 = vld [vmem:[%s3855_s6 + $0xd8] sm:$0xff] }
 0x508   : > { %2311 = vperm.xlu0 %3072, %v2026_v8   ;;  %2218 = vperm.xlu1 %3071, %v2017_v54   ;;  %v3162_v8 = vld [vmem:[%s3855_s6 + $0xc8] sm:$0xff]  ;;  %v3163_v54 = vld [vmem:[%s3855_s6 + $0xc0] sm:$0xff]  ;;  %s2589_s6 = sshll.u32 %s2585_s12, 4  ;;  %s2590_s6 = int_to_ptr.hbm [resolvable:$true] %s2589_s6 }
 0x509   : > { %2137 = vperm.xlu2 %3073, %v2012_v14   ;;  %s3478_s18 = sshra.s32 %s2590_s6, 4  ;;  %s3479_s18 = int_to_ptr.hbm [resolvable:$true] %s3478_s18 }
 0x50a   : > { %p3485_p7 = scmp.lt.s32.totalorder %s3479_s18, %s5104_s21 }
 0x510   : > { %2224 = vperm.xlu1 %3071, %v2019_v29  }
 0x511   : > { %2221 = vperm.xlu2 %3073, %v2018_v10  }
 0x518   : > { %2173 = vperm.xlu1 %3071, %v2013_v1  }
 0x519   : > { %2227 = vperm.xlu2 %3073, %v2020_v16  }
 0x520   : > { %2263 = vperm.xlu1 %3071, %v2021_v48  }
 0x521   : > { %2179 = vperm.xlu2 %3073, %v2015_v24  }
 0x528   : > { %2269 = vperm.xlu1 %3071, %v2023_v63  }
 0x529   : > { %2182 = vperm.xlu2 %3073, %v2016_v23  }
 0x530   : > { %2356 = vperm.xlu1 %3071, %v2030_v15  }
 0x531   : > { %2353 = vperm.xlu2 %3073, %v2029_v56  }
 0x538   : > { %2308 = vperm.xlu1 %3071, %v2025_v28  }
 0x539   : > { %2362 = vperm.xlu2 %3073, %v2032_v30  }
 0x53b   : > { %v2084_v46 = vpop.permute.xlu2 %2083 }
 0x53c   : > { %v2094_v34 = vperm.slane %v2084_v46, %v4553_v31 }
 0x540   : > { %2317 = vperm.xlu1 %3071, %v2028_v45  }
 0x541   : > { %2314 = vperm.xlu2 %3073, %v2027_v36  }
 0x543   : > { %v2090_v21 = vpop.permute.xlu2 %2089 }
 0x544   : > { %v2097_v0 = vperm.slane %v2090_v21, %v4559_v47 }
 0x548   : > { %2500 = vrot.lane.b32.xlu1 %v5101_v4, %s3601_s4 }
 0x54b   : > { %v2039_v25 = vpop.permute.xlu2 %2038 }
 0x54c   : > { %v2049_v18 = vperm.slane %v2039_v25, %v4553_v31 }
 0x552   : > { %v2087_v58 = vpop.permute.xlu1 %2086  ;;  %v2135_v62 = vpop.permute.xlu0 %2134 }
 0x553   : > { %v2045_v27 = vpop.permute.xlu2 %2044  ;;  %v2095_v22 = vperm.slane %v2087_v58, %v4556_v42  ;;  %v2142_v50 = vperm.slane %v2135_v62, %v4559_v47 }
 0x554   : > { %v2052_v9 = vperm.slane %v2045_v27, %v4559_v47 }
 0x555   : > { %v2096_v61 = vsel %vm1605_vm8, %v2095_v22, %v2094_v34 }
 0x556   : > { %v2098_v3 = vsel %vm1609_vm9, %v2097_v0, %v2096_v61 }
 0x55a   : > { %v2093_v26 = vpop.permute.xlu1 %2092  ;;  %v2177_v16 = vpop.permute.xlu0 %2176 }
 0x55b   : > { %v2099_v13 = vperm.slane %v2093_v26, %v4570_v35  ;;  %v2132_v60 = vpop.permute.xlu2 %2131  ;;  %v2185_v30 = vperm.slane %v2177_v16, %v4556_v42 }
 0x55c   : > { %v2140_v44 = vperm.slane %v2132_v60, %v4556_v42 }
 0x55d   : > { %v2100_v41 = vsel %vm1613_vm10, %v2099_v13, %v2098_v3 }
 0x55e   : > { %2874 = vmatmul.msk.f32.vlgmr.msra.gmra.mxu2 %vm704_vm0, %v2100_v41 }
 0x55f   : > { %2385 = vmatpush.msra.mxu2 %v3156_v55 }
 0x561   : > { %2386 = vmatpush.msra.mxu2 %v3157_v57 }
 0x562   : > { %v2042_v17 = vpop.permute.xlu1 %2041  ;;  %v2267_v36 = vpop.permute.xlu0 %2266 }
 0x563   : > { %v2138_v19 = vpop.permute.xlu2 %2137  ;;  %2387 = vmatpush.msra.mxu2 %v3158_v6  ;;  %v2050_v49 = vperm.slane %v2042_v17, %v4556_v42  ;;  %v2275_v26 = vperm.slane %v2267_v36, %v4556_v42  ;;  %v2915_v36 = vld [vmem:[#allocation17 + $0x8] sm:$0xff] }
 0x564   : > { %v2144_v12 = vperm.slane %v2138_v19, %v4570_v35 }
 0x565   : > { %2388 = vmatpush.msra.mxu2 %v3159_v11  ;;  %v2051_v53 = vsel %vm1605_vm8, %v2050_v49, %v2049_v18 }
 0x566   : > { %v2053_v39 = vsel %vm1609_vm9, %v2052_v9, %v2051_v53 }
 0x56a   : > { %v2129_v40 = vpop.permute.xlu1 %2128  ;;  %v2273_v34 = vpop.permute.xlu0 %2272 }
 0x56b   : > { %v2139_v37 = vperm.slane %v2129_v40, %v4553_v31  ;;  %v2222_v2 = vpop.permute.xlu2 %2221  ;;  %v2279_v3 = vperm.slane %v2273_v34, %v4570_v35 }
 0x56c   : > { %v2230_v10 = vperm.slane %v2222_v2, %v4556_v42 }
 0x56d   : > { %v2141_v43 = vsel %vm1605_vm8, %v2140_v44, %v2139_v37 }
 0x56e   : > { %v2143_v38 = vsel %vm1609_vm9, %v2142_v50, %v2141_v43 }
 0x56f   : > { %v2145_v59 = vsel %vm1613_vm10, %v2144_v12, %v2143_v38 }
 0x570   : > { %2875 = vmatmul.msk.f32.vlgmr.msra.gmra.mxu3 %vm704_vm0, %v2145_v59 }
 0x571   : > { %2469 = vmatpush.bf16.msra.mxu3 %v2915_v36 }
 0x572   : > { %v2048_v5 = vpop.permute.xlu1 %2047  ;;  %v2360_v17 = vpop.permute.xlu0 %2359 }
 0x573   : > { %v2054_v33 = vperm.slane %v2048_v5, %v4570_v35  ;;  %v2228_v51 = vpop.permute.xlu2 %2227  ;;  %v2367_v40 = vperm.slane %v2360_v17, %v4559_v47 }
 0x574   : > { %v2234_v24 = vperm.slane %v2228_v51, %v4570_v35 }
 0x575   : > { %v2055_v20 = vsel %vm1613_vm10, %v2054_v33, %v2053_v39 }
 0x576   : > { %2873 = vmatmul.msk.f32.vlgmr.msra.gmra.mxu0 %vm704_vm0, %v2055_v20 }
 0x577   : > { %2340 = vmatpush.msra.mxu0 %v3160_v7 }
 0x579   : > { %2341 = vmatpush.msra.mxu0 %v3161_v32 }
 0x57a   : > { %v2219_v52 = vpop.permute.xlu1 %2218  ;;  %v2312_v12 = vpop.permute.xlu0 %2311 }
 0x57b   : > { %2342 = vmatpush.msra.mxu0 %v3162_v8  ;;  %v2229_v14 = vperm.slane %v2219_v52, %v4553_v31  ;;  %v2180_v29 = vpop.permute.xlu2 %2179  ;;  %v2320_v38 = vperm.slane %v2312_v12, %v4556_v42 }
 0x57c   : > { %v2187_v45 = vperm.slane %v2180_v29, %v4559_v47 }
 0x57d   : > { %2343 = vmatpush.msra.mxu0 %v3163_v54  ;;  %v2231_v63 = vsel %vm1605_vm8, %v2230_v10, %v2229_v14 }
 0x582   : > { %v2225_v1 = vpop.permute.xlu1 %2224 }
 0x583   : > { %v2232_v48 = vperm.slane %v2225_v1, %v4559_v47  ;;  %v2183_v56 = vpop.permute.xlu2 %2182 }
 0x584   : > { %v2189_v21 = vperm.slane %v2183_v56, %v4570_v35 }
 0x585   : > { %v2233_v23 = vsel %vm1609_vm9, %v2232_v48, %v2231_v63 }
 0x586   : > { %v2235_v15 = vsel %vm1613_vm10, %v2234_v24, %v2233_v23 }
 0x587   : > { %2877 = vmatmul.msk.f32.vlgmr.msrb.gmra.mxu2 %vm704_vm0, %v2235_v15 }
 0x58a   : > { %v2174_v28 = vpop.permute.xlu1 %2173 }
 0x58b   : > { %v2184_v46 = vperm.slane %v2174_v28, %v4553_v31  ;;  %v2354_v61 = vpop.permute.xlu2 %2353  ;;  %v5102_v28 = vld [vmem:[#allocation35_spill] sm:$0xff] }
 0x58c   : > { %v2364_v11 = vperm.slane %v2354_v61, %v4553_v31 }
 0x58d   : > { %v2186_v25 = vsel %vm1605_vm8, %v2185_v30, %v2184_v46  ;;  %v2881_v30 = vmul.f32 -1.442695, %v5101_v4 }
 0x58e   : > { %v2188_v58 = vsel %vm1609_vm9, %v2187_v45, %v2186_v25 }
 0x58f   : > { %v2190_v27 = vsel %vm1613_vm10, %v2189_v21, %v2188_v58  ;;  %3144 = vpow2.f32 %v2881_v30  ;;  %v2913_v21 = vld [vmem:[%s5045_s10] sm:$0xff] }
 0x590   : > { %2876 = vmatmul.msk.f32.vlgmr.msrb.gmra.mxu0 %vm704_vm0, %v2190_v27  ;;  %v702_v58 = vld [vmem:[%s542_s22] sm:$0xff]  ;;  %v2914_v27 = vld [vmem:[#allocation17] sm:$0xff]  ;;  %s3480_s22 = scalar_lea.hbm %s3479_s18, 8 }
 0x591   : > { %2493 = vmatpush.bf16.msrb.mxu0 %v2913_v21  ;;  %2470 = vmatpush.bf16.msra.mxu3 %v2914_v27  ;;  %p3481_p1 = scmp.ne.s32.totalorder %s3479_s18, %s3480_s22  ;;  %p3486_p9 = scmp.lt.s32.totalorder %s3484_s20, %s3480_s22 }
 0x592   : > { %v2264_v22 = vpop.permute.xlu1 %2263 }
 0x593   : > { %v2274_v0 = vperm.slane %v2264_v22, %v4553_v31  ;;  %v2363_v19 = vpop.permute.xlu2 %2362  ;;  %v703_v22 = vpack.c.bf16 %v702_v58, %v702_v58  ;;  %p3482_p3 = pnand %p3481_p1, %p3795_p4  ;;  %p3487_p5 = por %p3486_p9, %p3485_p7 }
 0x594   : > { %v2369_v44 = vperm.slane %v2363_v19, %v4570_v35 }
 0x595   : > { %v2276_v41 = vsel %vm1605_vm8, %v2275_v26, %v2274_v0  ;;  %v3145_v46 = vpop.eup %3144  ;;  %p3483_p12 = pneg %p3482_p3 }
 0x596   : > { %v2396_v45 = vadd.f32 1.0, %v3145_v46 }
 0x597   : > { %p3488_p8 = pnand %p3487_p5, %p3483_p12 }
 0x598   : > { %3146 = vrcp.f32 %v2396_v45  ;;  %v2408_v26 = vand.u32 2147483648, %v2396_v45  ;;  %vm2402_vm13 = vweird.f32 %v2396_v45 }
 0x59a   : > { %v2270_v13 = vpop.permute.xlu1 %2269 }
 0x59b   : > { %v2277_v60 = vperm.slane %v2270_v13, %v4559_v47  ;;  %v2315_v18 = vpop.permute.xlu2 %2314  ;;  %v2406_v13 = vand.u32 2147483647, %v2396_v45 }
 0x59c   : > { %v2322_v53 = vperm.slane %v2315_v18, %v4559_v47 }
 0x59d   : > { %v2278_v55 = vsel %vm1609_vm9, %v2277_v60, %v2276_v41  ;;  %vm2407_vm15 = vcmp.eq.f32.partialorder %v2406_v13, 8.507059e+37 }
 0x59e   : > { %v2280_v57 = vsel %vm1613_vm10, %v2279_v3, %v2278_v55  ;;  %v3147_v25 = vpop.eup %3146  ;;  %v2409_v3 = vor.u32 1.1754944e-38, %v2408_v26 }
 0x59f   : > { %2878 = vmatmul.msk.f32.vlgmr.msrb.gmra.mxu3 %vm704_vm0, %v2280_v57  ;;  %v2398_v34 = vmul.f32 %v3147_v25, %v2396_v45  ;;  %vm2403_vm12 = vweird.f32 %v3147_v25 }
 0x5a0   : > { %vm2404_vm14 = vmor %vm2402_vm13, %vm2403_vm12 }
 0x5a1   : > { %v2399_v4 = vsub.f32 1.0, %v2398_v34 }
 0x5a2   : > { %v2357_v6 = vpop.permute.xlu1 %2356 }
 0x5a3   : > { %v2365_v62 = vperm.slane %v2357_v6, %v4556_v42  ;;  %v2400_v61 = vmul.f32 %v3147_v25, %v2399_v4 }
 0x5a5   : > { %v2366_v37 = vsel %vm1605_vm8, %v2365_v62, %v2364_v11  ;;  %v2401_v0 = vadd.f32 %v3147_v25, %v2400_v61 }
 0x5a6   : > { %v2368_v50 = vsel %vm1609_vm9, %v2367_v40, %v2366_v37 }
 0x5a7   : > { %v2370_v2 = vsel %vm1613_vm10, %v2369_v44, %v2368_v50  ;;  %v2405_v60 = vsel %vm2404_vm14, %v3147_v25, %v2401_v0 }
 0x5a8   : > { %2880 = vmatmul.msk.f32.vlgmr.msra.gmra.mxu2 %vm704_vm0, %v2370_v2  ;;  %v2410_v41 = vsel %vm2407_vm15, %v2409_v3, %v2405_v60 }
 0x5aa   : > { %v2309_v49 = vpop.permute.xlu1 %2308 }
 0x5ab   : > { %v2319_v43 = vperm.slane %v2309_v49, %v4553_v31 }
 0x5ad   : > { %v2321_v59 = vsel %vm1605_vm8, %v2320_v38, %v2319_v43 }
 0x5ae   : > { %v2323_v33 = vsel %vm1609_vm9, %v2322_v53, %v2321_v59 }
 0x5b2   : > { %v2318_v9 = vpop.permute.xlu1 %2317 }
 0x5b3   : > { %v2324_v5 = vperm.slane %v2318_v9, %v4570_v35 }
 0x5b5   : > { %v2325_v39 = vsel %vm1613_vm10, %v2324_v5, %v2323_v33 }
 0x5b6   : > { %2879 = vmatmul.msk.f32.vlgmr.msra.gmra.mxu0 %vm704_vm0, %v2325_v39 }
 0x5ba   : > { %v2501_v44 = vpop.permute.xlu1 %2500 }
 0x5be   : > { %2895 = vmatmul.msk.bf16.vlgmr.msrb.gmra.mxu0 %vm2482_vm11, %v703_v22 }
 0x5e1   : > { %v2120_v20 = vpop.f32.mrf.mxu2 }
 0x5e2   : > { %v2420_v42 = vrot.slane %v2120_v20, 7 }
 0x5f3   : > { %v2075_v51 = vpop.f32.mrf.mxu0  ;;  %v2165_v7 = vpop.f32.mrf.mxu3 }
 0x5f4   : > { %v2422_v52 = vrot.slane %v2165_v7, 6  ;;  %v2421_v8 = vsel %vm849_vm1, %v2420_v42, %v2075_v51  ;;  %vm2504_vm1 = vcmask 523264  }
 0x5f6   : > { %v2423_v14 = vsel %vm851_vm2, %v2422_v52, %v2421_v8  ;;  %v5103_v52 = vld [vmem:[#allocation33_spill] sm:$0xff] }
 0x60a   : > { %v2255_v31 = vpop.f32.mrf.mxu2 }
 0x60b   : > { %v2426_v10 = vrot.slane %v2255_v31, 4 }
 0x60d   : > { %v2210_v32 = vpop.f32.mrf.mxu0 }
 0x60e   : > { %v2424_v54 = vrot.slane %v2210_v32, 5 }
 0x610   : > { %v2425_v35 = vsel %vm853_vm3, %v2424_v54, %v2423_v14 }
 0x611   : > { %v2427_v48 = vsel %vm855_vm4, %v2426_v10, %v2425_v35 }
 0x622   : > { %v2300_v47 = vpop.f32.mrf.mxu3 }
 0x623   : > { %v2428_v29 = vrot.slane %v2300_v47, 3 }
 0x625   : > { %v2429_v63 = vsel %vm857_vm5, %v2428_v29, %v2427_v48 }
 0x62b   : > { %v2390_v1 = vpop.f32.mrf.mxu2 }
 0x62c   : > { %v2432_v23 = vrot.slane %v2390_v1, 1 }
 0x633   : > { %v2345_v16 = vpop.f32.mrf.mxu0 }
 0x634   : > { %v2430_v24 = vrot.slane %v2345_v16, 2 }
 0x636   : > { %v2431_v15 = vsel %vm859_vm6, %v2430_v24, %v2429_v63 }
 0x637   : > { %v2433_v56 = vsel %vm861_vm7, %v2432_v23, %v2431_v15 }
 0x638   : > { %2434 = vrot.lane.b32.xlu0 %v2433_v56, %s3602_s9 }
 0x63b   : > { %v2495_v6 = vpop.f32.mrf.mxu0 }
 0x640   : > { %2502 = vrot.lane.b32.xlu0 %v5102_v28, %s3601_s4 }
 0x643   : > { %v2497_v11 = vpop.f32.mrf.mxu0 }
 0x6aa   : > { %v2435_v55 = vpop.permute.xlu0 %2434 }
 0x6ab   : > { %v2437_v57 = vmul.f32 %v2435_v55, %v2410_v41 }
 0x6ad   : > { %v2440_v17 = vpack.c.bf16 %v2437_v57, %v2437_v57 }
 0x6af   : > { %2446 = vrot.lane.b32.xlu2 %v2440_v17, %s3603_s24 }
 0x6b2   : > { %v2503_v62 = vpop.permute.xlu0 %2502 }
 0x6b3   : > { %v2505_v50 = vsel %vm2504_vm1, %v2501_v44, %v2503_v62 }
 0x709   : > { %v2447_v19 = vpop.permute.xlu2 %2446 }
 0x70a   : > { %2890 = vmatmul.msk.bf16.vlgmr.msra.gmra.mxu3 %vm704_vm0, %v2447_v19 }
 0x78d   : > { %v2472_v40 = vpop.f32.mrf.mxu3 }
 0x78e   : > { %v2496_v37 = vadd.f32 %v2495_v6, %v2472_v40 }
 0x790   : > { %v2507_v2 = vadd.f32 %v2505_v50, %v2496_v37 }
 0x792   : > { %3148 = vtanh.f32 %v2507_v2  ;;  %v2896_v43 = vmul.f32 -1.442695, %v2507_v2 }
 0x794   : > { %3150 = vpow2.f32 %v2896_v43 }
 0x795   : > { %v2474_v49 = vpop.f32.mrf.mxu3 }
 0x798   : > { %v3149_v12 = vpop.eup %3148 }
 0x799   : > { %2530 = vrot.lane.b32.xlu2 %v3149_v12, %s3601_s4 }
 0x79a   : > { %v3151_v38 = vpop.eup %3150 }
 0x79b   : > { %v2511_v18 = vadd.f32 1.0, %v3151_v38 }
 0x79d   : > { %3152 = vrcp.f32 %v2511_v18  ;;  %v2523_v39 = vand.u32 2147483648, %v2511_v18  ;;  %vm2517_vm3 = vweird.f32 %v2511_v18  ;;  %v2521_v20 = vand.u32 2147483647, %v2511_v18 }
 0x79f   : > { %v2524_v7 = vor.u32 1.1754944e-38, %v2523_v39  ;;  %vm2522_vm5 = vcmp.eq.f32.partialorder %v2521_v20, 8.507059e+37 }
 0x7a3   : > { %v3153_v59 = vpop.eup %3152 }
 0x7a4   : > { %v2513_v53 = vmul.f32 %v3153_v59, %v2511_v18  ;;  %vm2518_vm2 = vweird.f32 %v3153_v59 }
 0x7a5   : > { %vm2519_vm4 = vmor %vm2517_vm3, %vm2518_vm2 }
 0x7a6   : > { %v2514_v9 = vsub.f32 1.0, %v2513_v53 }
 0x7a8   : > { %v2515_v5 = vmul.f32 %v3153_v59, %v2514_v9 }
 0x7aa   : > { %v2516_v33 = vadd.f32 %v3153_v59, %v2515_v5 }
 0x7ac   : > { %v2520_v51 = vsel %vm2519_vm4, %v3153_v59, %v2516_v33 }
 0x7ad   : > { %v2525_v32 = vsel %vm2522_vm5, %v2524_v7, %v2520_v51 }
 0x7ae   : > { %v2528_v8 = vmul.f32 %v2525_v32, %v5103_v52 }
 0x7f3   : > { %v2531_v31 = vpop.permute.xlu2 %2530 }
 0x7f4   : > { %v2533_v42 = vmul.f32 %v2531_v31, %v2525_v32 }
 0x7f6   : > { %2535 = vrot.lane.b32.xlu1 %v2533_v42, %s3602_s9 }
 0x868   : > { %v2536_v54 = vpop.permute.xlu1 %2535 }
 0x869   : > { %v2538_v47 = vadd.f32 %v2536_v54, %v2528_v8 }
 0x86b   : > { %3154 = vtanh.f32 %v2538_v47  ;;  %2551 = vrot.lane.b32.xlu1 %v2538_v47, %s3603_s24 }
 0x871   : > { %v3155_v14 = vpop.eup %3154 }
 0x872   : > { %2541 = vrot.lane.b32.xlu0 %v3155_v14, %s3601_s4 }
 0x8dd   : > { %v2552_v35 = vpop.permute.xlu1 %2551 }
 0x8de   : > { %2554 = vst.msk [vmem:[%s635_s7] sm:$0xff] %vm704_vm0, %v2552_v35 }
 0x8df   : > { %3491 = shalt.err (!%p3488_p8)
}
 0x8e0   : > { %2959 = dma.vmem_to_hbm [thread:$0]  (%p3795_p4), %s2588_s27, 128, %s2590_s6, %s2561_s16  }
 0x8e1   : > { %s5105_s13 = sld [smem:[#allocation48_spill]]  ;;  %s628_s12 = scalar_lea.vmem [#allocation19], %s3863_s14 }
 0x8e2   : > { %s2573_s7 = sshll.u32 %s628_s12, 4  ;;  %s2556_s22 = scalar_lea.sflag [#allocation4], %s3851_s5  ;;  %s2574_s7 = int_to_ptr.vmem [resolvable:$true] %s2573_s7 }
 0x8e4   : > { %v2542_v29 = vpop.permute.xlu0 %2541 }
 0x8e5   : > { %v2544_v10 = vmul.f32 %v2542_v29, %v2525_v32 }
 0x8e7   : > { %2546 = vrot.lane.b32.xlu2 %v2544_v10, %s3602_s9  ;;  %s2571_s19 = scalar_lea.hbm %s5105_s13, %s2899_s8  ;;  %s3512_s8 = scalar_lea.hbm %s5105_s13, 16 }
 0x8e8   : > { %s2575_s18 = sshll.u32 %s2571_s19, 4  ;;  %s2576_s18 = int_to_ptr.hbm [resolvable:$true] %s2575_s18 }
 0x8e9   : > { %s3506_s15 = sshra.s32 %s2576_s18, 4  ;;  %s3507_s15 = int_to_ptr.hbm [resolvable:$true] %s3506_s15 }
 0x8ea   : > { %s3508_s27 = scalar_lea.hbm %s3507_s15, 8  ;;  %p3513_p0 = scmp.lt.s32.totalorder %s3507_s15, %s5105_s13 }
 0x8eb   : > { %p3509_p10 = scmp.ne.s32.totalorder %s3507_s15, %s3508_s27  ;;  %p3514_p2 = scmp.lt.s32.totalorder %s3512_s8, %s3508_s27 }
 0x8ed   : > { %p3510_p13 = pnand %p3509_p10, %p3795_p4  ;;  %p3515_p1 = por %p3514_p2, %p3513_p0 }
 0x8ef   : > { %p3511_p11 = pneg %p3510_p13 }
 0x8f1   : > { %p3516_p3 = pnand %p3515_p1, %p3511_p11 }
 0x941   : > { %v2547_v1 = vpop.permute.xlu2 %2546 }
 0x942   : > { %2549 = vst.msk [vmem:[%s628_s12] sm:$0xff] %vm704_vm0, %v2547_v1 }
 0x943   : > { %3519 = shalt.err (!%p3516_p3)
}
 0x944   : > { %2958 = dma.vmem_to_hbm [thread:$0]  (%p3795_p4), %s2574_s7, 128, %s2576_s18, %s2556_s22  }
 0x945 PF: > { %s2601_s5 = sand.u32 1, %s3574_s25   ;;  %p5106_p12 = scmp.ge.s32.totalorder %s3586_s28, 2 }
 0x946   : > { %s2602_s3 = scalar_lea.sflag [#allocation4], %s2601_s5 }
 0x947   : > { %p2995_p7 = pnand %p5106_p12, %p3799_p6 }
 0x949   : > { %p2996_p9 = pneg %p2995_p7 }
 0x94b   : > { %3565 = dma.done.wait (%p2996_p9), %s2602_s3, 128  }
 0x94c   : > { %3567 = vsyncadd (%p2996_p9), %s2602_s3, 4294967168  ;;  %s2612_s20 = scalar_lea.sflag [#allocation21], %s2601_s5 }
 0x94d   : > { %3569 = dma.done.wait (%p2996_p9), %s2612_s20, 128  }
 0x94e   : > { %3571 = vsyncadd (%p2996_p9), %s2612_s20, 4294967168  ;;  %s5107_s4 = sld [smem:[#allocation31_spill]]  ;;  %p37_p4 = scmp.ge.s32.totalorder %s3767_s30, 4  }
 0x94f   : > { %s5108_s27 = sld [smem:[#allocation32_spill]]  ;;  %s5109_s25 = smov %s3578_s26 }
 0x950   : > { %s5111_s28 = smov %s3767_s30  ;;  %39 = sbr.rel (!%p37_p4) target bundleno = 24 (0x18), region = 175 }
 0x954   : > { %s5110_s26 = smov %s5107_s4 }
 0x955   :  { %2618 = vsyncpa [#allocation3], 1 }
 0x956   :  { %2620 = vsyncpa [#allocation3 + $0x1], 1 }
 0x957   :  { %2621 = vsyncpa [#allocation6], 1 }
 0x958   :  { %2623 = vsyncpa [#allocation6 + $0x1], 1 }
 0x959   :  { %2624 = vsyncpa [#allocation9], 1 }
 0x95a   :  { %2625 = vsyncpa [#allocation12], 1 }
 0x95b   :  { %2626 = vsyncpa [#allocation15], 1 }
 0x95c   :  { %2627 = vsyncpa [#allocation18], 1 }
 0x95d   :  { %2628 = vsyncpa [#allocation4], 1 }
 0x95e   :  { %2630 = vsyncpa [#allocation4 + $0x1], 1 }
 0x95f   :  { %2631 = vsyncpa [#allocation21], 1 }
 0x960   :  { %2633 = vsyncpa [#allocation21 + $0x1], 1 }

</bundles_post_ra>
